<compile_context>
chip_gen: v5e
topology: v5e:2x2
jax: 0.10.0
libtpu: 0.0.40
codegen_flags: <defaults>
</compile_context>

<pallas_src>
import numpy as np
import jax
import jax.numpy as jnp
from jax import lax
from jax.experimental import pallas as pl
from jax.experimental.pallas import tpu as pltpu


# ----------------------------------------------------------------------------
# Init-time glue (plain numpy): VQC structure + RBS unitary decomposition.
# ----------------------------------------------------------------------------
def _pyramid_gate_list(K):
    """Triangular pyramid of nearest-neighbour RBS gates on K local qubits."""
    gates, param_ids = [], []
    p = 0
    for layer in range(K - 1):
        for j in range(K - 1 - layer):
            gates.append((j, j + 1))
            param_ids.append(p)
            p += 1
    return gates, param_ids, p


def QCNN_RBS_based_VQC(I, K):
    """Structure of the RBS-based convolutional VQC.
    Returns (num_params, Param_dictionary, RBS_dictionary)."""
    # TODO(synk): exact gate ordering of the original toolbox.QCNN_RBS_based_VQC
    # is reconstructed here; per-gate forward semantics (U.rho.U^T) are exact.
    local_gates, local_pids, n_params = _pyramid_gate_list(K)
    RBS_dictionary, Param_dictionary = {}, {}
    idx = 0
    for reg_offset in (0, I):                 # line register, then column register
        for w in range(I // K):               # non-overlapping windows of size K
            base = reg_offset + w * K
            for (a, b), pid in zip(local_gates, local_pids):
                RBS_dictionary[idx] = (base + a, base + b)
                Param_dictionary[idx] = pid
                idx += 1
    return n_params, Param_dictionary, RBS_dictionary


def RBS_Unitaries_I2(I, list_gates):
    """(a, b) -> (M_cos, M_sin), each (I^2, I^2) f32, such that
        U(theta) = eye + (cos(theta) - 1) * M_cos + sin(theta) * M_sin
    (== cos*M_cos + sin*M_sin + (eye - M_cos), as in the torch module)."""
    N = I * I
    out = {}
    for tup in dict.fromkeys(list_gates):     # dedupe, keep deterministic order
        a, b = tup
        M_cos = np.zeros((N, N), np.float32)
        M_sin = np.zeros((N, N), np.float32)
        if b < I:                             # gate inside the line register
            pairs = [(a * I + j, b * I + j) for j in range(I)]
        else:                                 # gate inside the column register
            a2, b2 = a - I, b - I
            pairs = [(i * I + a2, i * I + b2) for i in range(I)]
        for p, q in pairs:
            M_cos[p, p] = 1.0
            M_cos[q, q] = 1.0
            M_sin[p, q] = 1.0
            M_sin[q, p] = -1.0
        out[tup] = (M_cos, M_sin)
    return out


# ----------------------------------------------------------------------------
# Generation-aware VMEM budgeting.
# ----------------------------------------------------------------------------
def _vmem_capacity_bytes():
    try:
        return int(pltpu.get_tpu_info().vmem_capacity_bytes)
    except Exception:
        return 64 << 20                        # conservative (v7x physical VMEM)


def _compiler_params(resident_bytes, dims=None):
    kw = {}
    if dims is not None:
        kw["dimension_semantics"] = dims
    # Only raise the scoped VMEM limit when the kernel actually needs more than
    # the smallest default (16 MiB on v5e); clamp below physical capacity with
    # headroom so the same code path compiles on v5e/v6e/v7x.
    if resident_bytes > (12 << 20):
        cap = _vmem_capacity_bytes()
        kw["vmem_limit_bytes"] = int(min(resident_bytes + (4 << 20),
                                         cap - (8 << 20)))
    return pltpu.CompilerParams(**kw)


# ----------------------------------------------------------------------------
# Kernels.
# ----------------------------------------------------------------------------
def _compose_u(cm1_ref, sn_ref, ab_ref):
    """U_total = (I + S_{G-1}) ... (I + S_0), S_g = cm1[g]*A_g + sn[g]*B_g.
    Identity-free recurrence: acc <- acc + S_g @ acc."""
    G, n, _ = ab_ref.shape

    # Identity built once on the VPU; only the loop init value, not live
    # through the unrolled gate chain.
    row = lax.broadcasted_iota(jnp.int32, (n, n), 0)
    col = lax.broadcasted_iota(jnp.int32, (n, n), 1)
    eye = (row == col).astype(jnp.float32)

    def body(g, acc):
        ab = ab_ref[g].astype(jnp.float32)          # lane-dense (n, 2n) load
        s = cm1_ref[g] * ab[:, :n] + sn_ref[g] * ab[:, n:]
        return acc + jnp.dot(s, acc, preferred_element_type=jnp.float32)

    return lax.fori_loop(0, G, body, eye, unroll=True)


def _compose_u_kernel(cm1_ref, sn_ref, ab_ref, u_ref):
    u_ref[...] = _compose_u(cm1_ref, sn_ref, ab_ref).astype(u_ref.dtype)


def _apply_kernel(u_ref, rho_ref, out_ref):
    u = u_ref[...]
    rho = rho_ref[...].astype(jnp.float32)
    tmp = jnp.dot(u, rho, preferred_element_type=jnp.float32)
    out = jnp.dot(tmp, u.T, preferred_element_type=jnp.float32)
    out_ref[...] = out.astype(out_ref.dtype)


def _fused_forward_kernel(cm1_ref, sn_ref, ab_ref, rho_ref, out_ref):
    """Dynamic-theta path: compose the U chain first (G matmuls), then apply it
    to rho (2 matmuls) -> G+2 dependent matmuls instead of 2G through rho."""
    u = _compose_u(cm1_ref, sn_ref, ab_ref)
    rho = rho_ref[...].astype(jnp.float32)
    tmp = jnp.dot(u, rho, preferred_element_type=jnp.float32)
    out = jnp.dot(tmp, u.T, preferred_element_type=jnp.float32)
    out_ref[...] = out.astype(out_ref.dtype)


# ----------------------------------------------------------------------------
# Wrappers.
# ----------------------------------------------------------------------------
def compose_u_total(cm1, sn, ab):
    """One-time composition of the full gate chain into U_total (N, N) f32."""
    G, N, _ = ab.shape
    resident = ab.nbytes + 10 * N * N * 4
    if resident > _vmem_capacity_bytes() - (16 << 20):
        # TODO(synk): streamed/tiled Pallas compose for very large gate stacks;
        # init-time-only XLA fallback keeps the forward kernel unchanged.
        a = ab[:, :, :N].astype(jnp.float32)
        b = ab[:, :, N:].astype(jnp.float32)
        s = cm1[:, None, None] * a + sn[:, None, None] * b

        def step(acc, sg):
            return acc + sg @ acc, None

        u, _ = lax.scan(step, jnp.eye(N, dtype=jnp.float32), s)
        return u

    return pl.pallas_call(
        _compose_u_kernel,
        out_shape=jax.ShapeDtypeStruct((N, N), jnp.float32),
        in_specs=[
            pl.BlockSpec(memory_space=pltpu.MemorySpace.SMEM),   # cos(theta) - 1
            pl.BlockSpec(memory_space=pltpu.MemorySpace.SMEM),   # sin(theta)
            pl.BlockSpec(memory_space=pltpu.MemorySpace.VMEM),   # [A | B] bf16 slab
        ],
        out_specs=pl.BlockSpec(memory_space=pltpu.MemorySpace.VMEM),
        compiler_params=_compiler_params(resident),
    )(cm1, sn, ab)


def apply_u_total(u, rho):
    """rho_out = U rho U^T.  Accepts (N, N) or batched (B, N, N)."""
    if rho.ndim == 2:
        N = rho.shape[-1]
        resident = 8 * N * N * 4
        return pl.pallas_call(
            _apply_kernel,
            out_shape=jax.ShapeDtypeStruct((N, N), rho.dtype),
            in_specs=[pl.BlockSpec(memory_space=pltpu.MemorySpace.VMEM),
                      pl.BlockSpec(memory_space=pltpu.MemorySpace.VMEM)],
            out_specs=pl.BlockSpec(memory_space=pltpu.MemorySpace.VMEM),
            compiler_params=_compiler_params(resident),
        )(u, rho)

    # Batched: leading grid axis marked "parallel" so v7x's second TensorCore
    # (and v5e/v6e megacore) can take half the batch.
    B, N, _ = rho.shape
    resident = 12 * N * N * 4
    grid_spec = pltpu.PrefetchScalarGridSpec(
        num_scalar_prefetch=0,
        grid=(B,),
        in_specs=[pl.BlockSpec((N, N), lambda b: (0, 0)),        # U (resident)
                  pl.BlockSpec((None, N, N), lambda b: (b, 0, 0))],
        out_specs=pl.BlockSpec((None, N, N), lambda b: (b, 0, 0)),
    )
    return pl.pallas_call(
        _apply_kernel,
        out_shape=jax.ShapeDtypeStruct((B, N, N), rho.dtype),
        grid_spec=grid_spec,
        compiler_params=_compiler_params(resident, dims=("parallel",)),
    )(u, rho)


def fused_forward(cm1, sn, ab, rho):
    """Single-call compose+apply (dynamic-theta path)."""
    G, N, _ = ab.shape
    resident = ab.nbytes + 12 * N * N * 4
    return pl.pallas_call(
        _fused_forward_kernel,
        out_shape=jax.ShapeDtypeStruct((N, N), rho.dtype),
        in_specs=[
            pl.BlockSpec(memory_space=pltpu.MemorySpace.SMEM),
            pl.BlockSpec(memory_space=pltpu.MemorySpace.SMEM),
            pl.BlockSpec(memory_space=pltpu.MemorySpace.VMEM),
            pl.BlockSpec(memory_space=pltpu.MemorySpace.VMEM),
        ],
        out_specs=pl.BlockSpec(memory_space=pltpu.MemorySpace.VMEM),
        compiler_params=_compiler_params(resident),
    )(cm1, sn, ab, rho)


# ----------------------------------------------------------------------------
# Module equivalent.
# ----------------------------------------------------------------------------
class ConvRBSDensityI2Parameters:
    """JAX/Pallas equivalent of Conv_RBS_density_I2_Parameters."""

    def __init__(self, I, K, conv_params):
        _, param_dict, rbs_dict = QCNN_RBS_based_VQC(I, K)
        list_gates = [rbs_dict[k] for k in rbs_dict]
        unitaries = RBS_Unitaries_I2(I, list_gates)
        thetas = np.array(
            [conv_params[param_dict[i]] for i in range(len(list_gates))],
            dtype=np.float32)
        self.thetas = thetas
        A = np.stack([unitaries[t][0] for t in list_gates])
        B = np.stack([unitaries[t][1] for t in list_gates])
        self.A, self.B = A, B
        # Entries are exactly {0, +-1}: bf16 is lossless.  Pack [A | B] into a
        # lane-dense (G, N, 2N) slab (2N = 128 lanes at N = 64).
        self.AB = jnp.asarray(np.concatenate([A, B], axis=-1), jnp.bfloat16)
        self.cm1 = jnp.asarray(np.cos(thetas) - 1.0, jnp.float32)
        self.sin = jnp.asarray(np.sin(thetas), jnp.float32)
        # Thetas are fixed at construction (requires_grad=False in the torch
        # module): pre-compose the full gate chain once.
        self.U = jax.block_until_ready(
            compose_u_total(self.cm1, self.sin, self.AB))

    def __call__(self, input_state, *, dynamic=False):
        if dynamic:
            return fused_forward(self.cm1, self.sin, self.AB, input_state)
        return apply_u_total(self.U, input_state)


# ----------------------------------------------------------------------------
# Pure numpy reference replicating the PyTorch forward loop.
# ----------------------------------------------------------------------------
def reference_forward(rho, A, B, thetas):
    rho = np.asarray(rho, np.float32)
    N = rho.shape[0]
    eye = np.eye(N, dtype=np.float32)
    for g in range(A.shape[0]):
        U = np.cos(thetas[g]) * A[g] + np.sin(thetas[g]) * B[g] + (eye - A[g])
        rho = U @ rho @ U.T
    return rho


if __name__ == "__main__":
    I, K = 8, 2                       # 8x8 image basis -> rho is 64x64, 8 gates
    n_params = K * (K - 1) // 2

    key = jax.random.PRNGKey(0)
    k_params, k_rho = jax.random.split(key)
    conv_params = jax.random.uniform(k_params, (n_params,), jnp.float32,
                                     minval=0.0, maxval=2.0 * np.pi)

    N = I * I
    M = jax.random.normal(k_rho, (N, N), jnp.float32)
    rho = M @ M.T
    rho = rho / jnp.trace(rho)        # valid density matrix (PSD, trace 1)

    layer = ConvRBSDensityI2Parameters(I, K, np.asarray(conv_params))

    out = jax.block_until_ready(layer(rho))                      # precomposed path
    out_dyn = jax.block_until_ready(layer(rho, dynamic=True))    # fused path
    out_batched = jax.block_until_ready(layer(jnp.stack([rho, 2.0 * rho])))

    ref = reference_forward(np.asarray(rho), layer.A, layer.B, layer.thetas)
    # Tolerance covers MXU f32 pass-ordering differences across the composed
    # chain; genuine semantic errors are O(1e-2) and would still be caught.
    np.testing.assert_allclose(np.asarray(out), ref, rtol=1e-3, atol=1e-4)
    np.testing.assert_allclose(np.asarray(out_dyn), ref, rtol=1e-3, atol=1e-4)
    np.testing.assert_allclose(np.asarray(out_batched[0]), ref,
                               rtol=1e-3, atol=1e-4)
    np.testing.assert_allclose(np.asarray(out_batched[1]), 2.0 * ref,
                               rtol=1e-3, atol=2e-4)
    print("KERNEL_OK")
</pallas_src>

<mosaic_0001>
module attributes {stable_mosaic.version = 11 : i64} {
  func.func @_compose_u_kernel(%arg0: memref<8xf32, #tpu.memory_space<smem>>, %arg1: memref<8xf32, #tpu.memory_space<smem>>, %arg2: memref<8x64x128xbf16, #tpu.memory_space<vmem>>, %arg3: memref<64x64xf32, #tpu.memory_space<vmem>>) attributes {dimension_semantics = [], scalar_prefetch = 0 : i64, scratch_operands = 0 : i64, tpu.core_type = #tpu.core_type<tc>} {
    %0 = tpu.iota {dimensions = array<i32: 0>} : vector<64x64xi32>
    %1 = tpu.iota {dimensions = array<i32: 1>} : vector<64x64xi32>
    %2 = arith.cmpi eq, %0, %1 : vector<64x64xi32>
    %3 = arith.extui %2 : vector<64x64xi1> to vector<64x64xi32>
    %4 = arith.sitofp %3 : vector<64x64xi32> to vector<64x64xf32>
    %c0_i32 = arith.constant 0 : i32
    %5 = arith.index_cast %c0_i32 : i32 to index
    %c0 = arith.constant 0 : index
    %c0_0 = arith.constant 0 : index
    %6 = vector.load %arg2[%5, %c0, %c0_0] : memref<8x64x128xbf16, #tpu.memory_space<vmem>>, vector<1x64x128xbf16>
    %7 = vector.shape_cast %6 : vector<1x64x128xbf16> to vector<64x128xbf16>
    %8 = arith.extf %7 : vector<64x128xbf16> to vector<64x128xf32>
    %9 = arith.index_cast %c0_i32 : i32 to index
    %10 = memref.load %arg0[%9] : memref<8xf32, #tpu.memory_space<smem>>
    %11 = vector.extract_strided_slice %8 {offsets = [0, 0], sizes = [64, 64], strides = [1, 1]} : vector<64x128xf32> to vector<64x64xf32>
    %12 = vector.broadcast %10 : f32 to vector<64x64xf32>
    %13 = arith.mulf %12, %11 : vector<64x64xf32>
    %14 = arith.index_cast %c0_i32 : i32 to index
    %15 = memref.load %arg1[%14] : memref<8xf32, #tpu.memory_space<smem>>
    %16 = vector.extract_strided_slice %8 {offsets = [0, 64], sizes = [64, 64], strides = [1, 1]} : vector<64x128xf32> to vector<64x64xf32>
    %17 = vector.broadcast %15 : f32 to vector<64x64xf32>
    %18 = arith.mulf %17, %16 : vector<64x64xf32>
    %19 = arith.addf %13, %18 : vector<64x64xf32>
    %cst = arith.constant dense<0.000000e+00> : vector<64x64xf32>
    %20 = tpu.matmul %19, %4, %cst {dimension_numbers = #tpu.dot_dimension_numbers<[1], [0], [0], [1], [0, 0, 1, 1], [], []>} : vector<64x64xf32>, vector<64x64xf32>, vector<64x64xf32> -> vector<64x64xf32>
    %21 = arith.addf %4, %20 : vector<64x64xf32>
    %c1_i32 = arith.constant 1 : i32
    %22 = arith.index_cast %c1_i32 : i32 to index
    %c0_1 = arith.constant 0 : index
    %c0_2 = arith.constant 0 : index
    %23 = vector.load %arg2[%22, %c0_1, %c0_2] : memref<8x64x128xbf16, #tpu.memory_space<vmem>>, vector<1x64x128xbf16>
    %24 = vector.shape_cast %23 : vector<1x64x128xbf16> to vector<64x128xbf16>
    %25 = arith.extf %24 : vector<64x128xbf16> to vector<64x128xf32>
    %26 = arith.index_cast %c1_i32 : i32 to index
    %27 = memref.load %arg0[%26] : memref<8xf32, #tpu.memory_space<smem>>
    %28 = vector.extract_strided_slice %25 {offsets = [0, 0], sizes = [64, 64], strides = [1, 1]} : vector<64x128xf32> to vector<64x64xf32>
    %29 = vector.broadcast %27 : f32 to vector<64x64xf32>
    %30 = arith.mulf %29, %28 : vector<64x64xf32>
    %31 = arith.index_cast %c1_i32 : i32 to index
    %32 = memref.load %arg1[%31] : memref<8xf32, #tpu.memory_space<smem>>
    %33 = vector.extract_strided_slice %25 {offsets = [0, 64], sizes = [64, 64], strides = [1, 1]} : vector<64x128xf32> to vector<64x64xf32>
    %34 = vector.broadcast %32 : f32 to vector<64x64xf32>
    %35 = arith.mulf %34, %33 : vector<64x64xf32>
    %36 = arith.addf %30, %35 : vector<64x64xf32>
    %cst_3 = arith.constant dense<0.000000e+00> : vector<64x64xf32>
    %37 = tpu.matmul %36, %21, %cst_3 {dimension_numbers = #tpu.dot_dimension_numbers<[1], [0], [0], [1], [0, 0, 1, 1], [], []>} : vector<64x64xf32>, vector<64x64xf32>, vector<64x64xf32> -> vector<64x64xf32>
    %38 = arith.addf %21, %37 : vector<64x64xf32>
    %c2_i32 = arith.constant 2 : i32
    %39 = arith.index_cast %c2_i32 : i32 to index
    %c0_4 = arith.constant 0 : index
    %c0_5 = arith.constant 0 : index
    %40 = vector.load %arg2[%39, %c0_4, %c0_5] : memref<8x64x128xbf16, #tpu.memory_space<vmem>>, vector<1x64x128xbf16>
    %41 = vector.shape_cast %40 : vector<1x64x128xbf16> to vector<64x128xbf16>
    %42 = arith.extf %41 : vector<64x128xbf16> to vector<64x128xf32>
    %43 = arith.index_cast %c2_i32 : i32 to index
    %44 = memref.load %arg0[%43] : memref<8xf32, #tpu.memory_space<smem>>
    %45 = vector.extract_strided_slice %42 {offsets = [0, 0], sizes = [64, 64], strides = [1, 1]} : vector<64x128xf32> to vector<64x64xf32>
    %46 = vector.broadcast %44 : f32 to vector<64x64xf32>
    %47 = arith.mulf %46, %45 : vector<64x64xf32>
    %48 = arith.index_cast %c2_i32 : i32 to index
    %49 = memref.load %arg1[%48] : memref<8xf32, #tpu.memory_space<smem>>
    %50 = vector.extract_strided_slice %42 {offsets = [0, 64], sizes = [64, 64], strides = [1, 1]} : vector<64x128xf32> to vector<64x64xf32>
    %51 = vector.broadcast %49 : f32 to vector<64x64xf32>
    %52 = arith.mulf %51, %50 : vector<64x64xf32>
    %53 = arith.addf %47, %52 : vector<64x64xf32>
    %cst_6 = arith.constant dense<0.000000e+00> : vector<64x64xf32>
    %54 = tpu.matmul %53, %38, %cst_6 {dimension_numbers = #tpu.dot_dimension_numbers<[1], [0], [0], [1], [0, 0, 1, 1], [], []>} : vector<64x64xf32>, vector<64x64xf32>, vector<64x64xf32> -> vector<64x64xf32>
    %55 = arith.addf %38, %54 : vector<64x64xf32>
    %c3_i32 = arith.constant 3 : i32
    %56 = arith.index_cast %c3_i32 : i32 to index
    %c0_7 = arith.constant 0 : index
    %c0_8 = arith.constant 0 : index
    %57 = vector.load %arg2[%56, %c0_7, %c0_8] : memref<8x64x128xbf16, #tpu.memory_space<vmem>>, vector<1x64x128xbf16>
    %58 = vector.shape_cast %57 : vector<1x64x128xbf16> to vector<64x128xbf16>
    %59 = arith.extf %58 : vector<64x128xbf16> to vector<64x128xf32>
    %60 = arith.index_cast %c3_i32 : i32 to index
    %61 = memref.load %arg0[%60] : memref<8xf32, #tpu.memory_space<smem>>
    %62 = vector.extract_strided_slice %59 {offsets = [0, 0], sizes = [64, 64], strides = [1, 1]} : vector<64x128xf32> to vector<64x64xf32>
    %63 = vector.broadcast %61 : f32 to vector<64x64xf32>
    %64 = arith.mulf %63, %62 : vector<64x64xf32>
    %65 = arith.index_cast %c3_i32 : i32 to index
    %66 = memref.load %arg1[%65] : memref<8xf32, #tpu.memory_space<smem>>
    %67 = vector.extract_strided_slice %59 {offsets = [0, 64], sizes = [64, 64], strides = [1, 1]} : vector<64x128xf32> to vector<64x64xf32>
    %68 = vector.broadcast %66 : f32 to vector<64x64xf32>
    %69 = arith.mulf %68, %67 : vector<64x64xf32>
    %70 = arith.addf %64, %69 : vector<64x64xf32>
    %cst_9 = arith.constant dense<0.000000e+00> : vector<64x64xf32>
    %71 = tpu.matmul %70, %55, %cst_9 {dimension_numbers = #tpu.dot_dimension_numbers<[1], [0], [0], [1], [0, 0, 1, 1], [], []>} : vector<64x64xf32>, vector<64x64xf32>, vector<64x64xf32> -> vector<64x64xf32>
    %72 = arith.addf %55, %71 : vector<64x64xf32>
    %c4_i32 = arith.constant 4 : i32
    %73 = arith.index_cast %c4_i32 : i32 to index
    %c0_10 = arith.constant 0 : index
    %c0_11 = arith.constant 0 : index
    %74 = vector.load %arg2[%73, %c0_10, %c0_11] : memref<8x64x128xbf16, #tpu.memory_space<vmem>>, vector<1x64x128xbf16>
    %75 = vector.shape_cast %74 : vector<1x64x128xbf16> to vector<64x128xbf16>
    %76 = arith.extf %75 : vector<64x128xbf16> to vector<64x128xf32>
    %77 = arith.index_cast %c4_i32 : i32 to index
    %78 = memref.load %arg0[%77] : memref<8xf32, #tpu.memory_space<smem>>
    %79 = vector.extract_strided_slice %76 {offsets = [0, 0], sizes = [64, 64], strides = [1, 1]} : vector<64x128xf32> to vector<64x64xf32>
    %80 = vector.broadcast %78 : f32 to vector<64x64xf32>
    %81 = arith.mulf %80, %79 : vector<64x64xf32>
    %82 = arith.index_cast %c4_i32 : i32 to index
    %83 = memref.load %arg1[%82] : memref<8xf32, #tpu.memory_space<smem>>
    %84 = vector.extract_strided_slice %76 {offsets = [0, 64], sizes = [64, 64], strides = [1, 1]} : vector<64x128xf32> to vector<64x64xf32>
    %85 = vector.broadcast %83 : f32 to vector<64x64xf32>
    %86 = arith.mulf %85, %84 : vector<64x64xf32>
    %87 = arith.addf %81, %86 : vector<64x64xf32>
    %cst_12 = arith.constant dense<0.000000e+00> : vector<64x64xf32>
    %88 = tpu.matmul %87, %72, %cst_12 {dimension_numbers = #tpu.dot_dimension_numbers<[1], [0], [0], [1], [0, 0, 1, 1], [], []>} : vector<64x64xf32>, vector<64x64xf32>, vector<64x64xf32> -> vector<64x64xf32>
    %89 = arith.addf %72, %88 : vector<64x64xf32>
    %c5_i32 = arith.constant 5 : i32
    %90 = arith.index_cast %c5_i32 : i32 to index
    %c0_13 = arith.constant 0 : index
    %c0_14 = arith.constant 0 : index
    %91 = vector.load %arg2[%90, %c0_13, %c0_14] : memref<8x64x128xbf16, #tpu.memory_space<vmem>>, vector<1x64x128xbf16>
    %92 = vector.shape_cast %91 : vector<1x64x128xbf16> to vector<64x128xbf16>
    %93 = arith.extf %92 : vector<64x128xbf16> to vector<64x128xf32>
    %94 = arith.index_cast %c5_i32 : i32 to index
    %95 = memref.load %arg0[%94] : memref<8xf32, #tpu.memory_space<smem>>
    %96 = vector.extract_strided_slice %93 {offsets = [0, 0], sizes = [64, 64], strides = [1, 1]} : vector<64x128xf32> to vector<64x64xf32>
    %97 = vector.broadcast %95 : f32 to vector<64x64xf32>
    %98 = arith.mulf %97, %96 : vector<64x64xf32>
    %99 = arith.index_cast %c5_i32 : i32 to index
    %100 = memref.load %arg1[%99] : memref<8xf32, #tpu.memory_space<smem>>
    %101 = vector.extract_strided_slice %93 {offsets = [0, 64], sizes = [64, 64], strides = [1, 1]} : vector<64x128xf32> to vector<64x64xf32>
    %102 = vector.broadcast %100 : f32 to vector<64x64xf32>
    %103 = arith.mulf %102, %101 : vector<64x64xf32>
    %104 = arith.addf %98, %103 : vector<64x64xf32>
    %cst_15 = arith.constant dense<0.000000e+00> : vector<64x64xf32>
    %105 = tpu.matmul %104, %89, %cst_15 {dimension_numbers = #tpu.dot_dimension_numbers<[1], [0], [0], [1], [0, 0, 1, 1], [], []>} : vector<64x64xf32>, vector<64x64xf32>, vector<64x64xf32> -> vector<64x64xf32>
    %106 = arith.addf %89, %105 : vector<64x64xf32>
    %c6_i32 = arith.constant 6 : i32
    %107 = arith.index_cast %c6_i32 : i32 to index
    %c0_16 = arith.constant 0 : index
    %c0_17 = arith.constant 0 : index
    %108 = vector.load %arg2[%107, %c0_16, %c0_17] : memref<8x64x128xbf16, #tpu.memory_space<vmem>>, vector<1x64x128xbf16>
    %109 = vector.shape_cast %108 : vector<1x64x128xbf16> to vector<64x128xbf16>
    %110 = arith.extf %109 : vector<64x128xbf16> to vector<64x128xf32>
    %111 = arith.index_cast %c6_i32 : i32 to index
    %112 = memref.load %arg0[%111] : memref<8xf32, #tpu.memory_space<smem>>
    %113 = vector.extract_strided_slice %110 {offsets = [0, 0], sizes = [64, 64], strides = [1, 1]} : vector<64x128xf32> to vector<64x64xf32>
    %114 = vector.broadcast %112 : f32 to vector<64x64xf32>
    %115 = arith.mulf %114, %113 : vector<64x64xf32>
    %116 = arith.index_cast %c6_i32 : i32 to index
    %117 = memref.load %arg1[%116] : memref<8xf32, #tpu.memory_space<smem>>
    %118 = vector.extract_strided_slice %110 {offsets = [0, 64], sizes = [64, 64], strides = [1, 1]} : vector<64x128xf32> to vector<64x64xf32>
    %119 = vector.broadcast %117 : f32 to vector<64x64xf32>
    %120 = arith.mulf %119, %118 : vector<64x64xf32>
    %121 = arith.addf %115, %120 : vector<64x64xf32>
    %cst_18 = arith.constant dense<0.000000e+00> : vector<64x64xf32>
    %122 = tpu.matmul %121, %106, %cst_18 {dimension_numbers = #tpu.dot_dimension_numbers<[1], [0], [0], [1], [0, 0, 1, 1], [], []>} : vector<64x64xf32>, vector<64x64xf32>, vector<64x64xf32> -> vector<64x64xf32>
    %123 = arith.addf %106, %122 : vector<64x64xf32>
    %c7_i32 = arith.constant 7 : i32
    %124 = arith.index_cast %c7_i32 : i32 to index
    %c0_19 = arith.constant 0 : index
    %c0_20 = arith.constant 0 : index
    %125 = vector.load %arg2[%124, %c0_19, %c0_20] : memref<8x64x128xbf16, #tpu.memory_space<vmem>>, vector<1x64x128xbf16>
    %126 = vector.shape_cast %125 : vector<1x64x128xbf16> to vector<64x128xbf16>
    %127 = arith.extf %126 : vector<64x128xbf16> to vector<64x128xf32>
    %128 = arith.index_cast %c7_i32 : i32 to index
    %129 = memref.load %arg0[%128] : memref<8xf32, #tpu.memory_space<smem>>
    %130 = vector.extract_strided_slice %127 {offsets = [0, 0], sizes = [64, 64], strides = [1, 1]} : vector<64x128xf32> to vector<64x64xf32>
    %131 = vector.broadcast %129 : f32 to vector<64x64xf32>
    %132 = arith.mulf %131, %130 : vector<64x64xf32>
    %133 = arith.index_cast %c7_i32 : i32 to index
    %134 = memref.load %arg1[%133] : memref<8xf32, #tpu.memory_space<smem>>
    %135 = vector.extract_strided_slice %127 {offsets = [0, 64], sizes = [64, 64], strides = [1, 1]} : vector<64x128xf32> to vector<64x64xf32>
    %136 = vector.broadcast %134 : f32 to vector<64x64xf32>
    %137 = arith.mulf %136, %135 : vector<64x64xf32>
    %138 = arith.addf %132, %137 : vector<64x64xf32>
    %cst_21 = arith.constant dense<0.000000e+00> : vector<64x64xf32>
    %139 = tpu.matmul %138, %123, %cst_21 {dimension_numbers = #tpu.dot_dimension_numbers<[1], [0], [0], [1], [0, 0, 1, 1], [], []>} : vector<64x64xf32>, vector<64x64xf32>, vector<64x64xf32> -> vector<64x64xf32>
    %140 = arith.addf %123, %139 : vector<64x64xf32>
    %c8_i32 = arith.constant 8 : i32
    %c0_22 = arith.constant 0 : index
    %c0_23 = arith.constant 0 : index
    %141 = vector.load %arg3[%c0_22, %c0_23] : memref<64x64xf32, #tpu.memory_space<vmem>>, vector<64x64xf32>
    tpu.vector_store %arg3[%c0_22, %c0_23], %140 {strides = array<i32>} : memref<64x64xf32, #tpu.memory_space<vmem>>, vector<64x64xf32>,
    return
  }
}

</mosaic_0001>

<bundles_post_ra>
// kernel: tpu_custom_call.1
= control target key start
LH: loop header
LB: loop body
LE: loop exit
PB: predicated region body
PF: predicated region fallthrough
CT: control target
= control target key end

     0   :  { %8 = vsyncpa [#allocation5], 0  ;;  %s2437_s0 = inlined_call_operand.hbm [shape: f32[8], index: 0, kind: input, shape index: {}]   ;;  %s2438_s1 = inlined_call_operand.hbm [shape: f32[8], index: 1, kind: input, shape index: {}]   ;;  %s2439_s2 = inlined_call_operand.hbm [shape: bf16[8,64,128], index: 2, kind: input, shape index: {}]   ;;  %s2440_s3 = inlined_call_operand.hbm [shape: f32[64,64], index: 3, kind: output, shape index: {}]  }
   0x1   :  { %9 = vsyncpa [#allocation7], 0 }
   0x2   :  { %10 = vsyncpa [#allocation3], 0 }
   0x3   :  { %11 = vsyncpa [#allocation4], 0  ;;  %s17_s14 = sshll.u32 %s2437_s0, 4  ;;  %s26_s17 = sshll.u32 %s2438_s1, 4  ;;  %s18_s14 = int_to_ptr.hbm [resolvable:$true] %s17_s14  ;;  %s27_s17 = int_to_ptr.hbm [resolvable:$true] %s26_s17 }
   0x4   :  { %s1656_s18 = smov [#allocation2]   ;;  %s1657_s19 = smov [#allocation6]  }
   0x5   :  { %20 = dma.hbm_to_smem %s18_s14, 16, %s1656_s18, [#allocation5]  }
   0x6   :  { %29 = dma.hbm_to_smem %s27_s17, 16, %s1657_s19, [#allocation7]  }
   0x7   :  { %s34_s22 = sshll.u32 %s2439_s2, 4  ;;  %s1658_s23 = smov [#allocation8]   ;;  %s35_s22 = int_to_ptr.hbm [resolvable:$true] %s34_s22 }
   0x8   :  { %s36_s24 = sshll.u32 %s1658_s23, 4  ;;  %s1659_s25 = smov 64   ;;  %s37_s24 = int_to_ptr.vmem [resolvable:$true] %s36_s24 }
   0x9   :  { %s1660_s0 = smov 4  }
   0xa   :  { %42 = dma.hbm_to_vmem [thread:$0]  %s35_s22, 4096, %s37_s24, [#allocation3], %s1659_s25, %s1659_s25, %s1660_s0  }
   0xb   :  { %1648 = dma.done.wait [#allocation5], 16  }
   0xc   :  { %1649 = vsyncadd [#allocation5], 4294967280 }
   0xd   :  { %1650 = dma.done.wait [#allocation7], 16  }
   0xe   :  { %1651 = vsyncadd [#allocation7], 4294967280 }
   0xf   :  { %1652 = dma.done.wait [#allocation3], 4096  }
  0x10   :  { %1653 = vsyncadd [#allocation3], 4294963200 }
  0x11   :  { %55 = sfence }
  0x12   :  { %v1697_v0 = vld [vmem:[#allocation8] sm:$0xff]   ;;  %s117_s1 = sld [smem:[#allocation6]]  ;;  %v1699_v1 = vld [vmem:[#allocation8 + $0x8] sm:$0xff]   ;;  %v56_v2 = vlaneseq  ;;  %v1701_v3 = vld [vmem:[#allocation8 + $0x10] sm:$0xff]   ;;  %v1661_v20 = vmov 1.0   ;;  %vm167_vm8 = vcmask 523264  }
  0x13   :  { %v1416_v4 = vunpack.c.l.bf16 %v1697_v0  ;;  %v1420_v5 = vunpack.c.l.bf16 %v1699_v1  ;;  %v1424_v7 = vunpack.c.l.bf16 %v1701_v3  ;;  %v1417_v15 = vunpack.c.h.bf16 %v1697_v0  ;;  %v1752_v25 = vld [vmem:[#allocation8 + $0x18] sm:$0xff]   ;;  %s107_s2 = sld [smem:[#allocation2]]  ;;  %v1802_v47 = vld [vmem:[#allocation8 + $0x20] sm:$0xff]   ;;  %v1804_v49 = vld [vmem:[#allocation8 + $0x28] sm:$0xff]   ;;  %s1663_s13 = smov [#allocation9]  }
  0x14   :  { %v1705_v6 = vshrl.u32 %v56_v2, 7  ;;  %v1711_v9 = vand.u32 127, %v56_v2  ;;  %v1421_v17 = vunpack.c.h.bf16 %v1699_v1  ;;  %v1425_v19 = vunpack.c.h.bf16 %v1701_v3  ;;  %s1345_s26 = sld [smem:[#allocation6 + $0x1]]  ;;  %v1809_v53 = vld [vmem:[#allocation8 + $0x30] sm:$0xff]   ;;  %s1303_s14 = sshll.u32 %s1663_s13, 4  ;;  %s1304_s14 = int_to_ptr.vmem [resolvable:$true] %s1303_s14 }
  0x15   :  { %v1428_v27 = vunpack.c.l.bf16 %v1752_v25  ;;  %v1429_v28 = vunpack.c.h.bf16 %v1752_v25  ;;  %v1433_v50 = vunpack.c.h.bf16 %v1802_v47  ;;  %v1436_v51 = vunpack.c.l.bf16 %v1804_v49  ;;  %s1344_s27 = sld [smem:[#allocation2 + $0x1]]  ;;  %s1305_s17 = sshll.u32 %s2440_s3, 4  ;;  %s1306_s17 = int_to_ptr.hbm [resolvable:$true] %s1305_s17 }
  0x16   :  { %v1709_v8 = vadd.s32 56, %v1705_v6  ;;  %v1714_v10 = vadd.s32 48, %v1705_v6  ;;  %v1719_v14 = vadd.s32 40, %v1705_v6  ;;  %v1732_v18 = vadd.s32 32, %v1705_v6  ;;  %s1355_s28 = sld [smem:[#allocation6 + $0x2]]  ;;  %s1664_s18 = smov 128  }
  0x17   :  { %v1742_v21 = vadd.s32 24, %v1705_v6  ;;  %v1750_v24 = vadd.s32 16, %v1705_v6  ;;  %v1782_v31 = vadd.s32 8, %v1705_v6  ;;  %vm67_vm7 = vcmp.eq.s32.totalorder %v1705_v6, %v1711_v9  ;;  %s1354_s29 = sld [smem:[#allocation2 + $0x2]]  ;;  %s1665_s19 = smov 8  }
  0x18   :  { %v118_v11 = vstv %s117_s1  ;;  %vm74_vm0 = vcmp.eq.s32.totalorder %v1709_v8, %v1711_v9  ;;  %vm73_vm1 = vcmp.eq.s32.totalorder %v1714_v10, %v1711_v9  ;;  %vm72_vm2 = vcmp.eq.s32.totalorder %v1719_v14, %v1711_v9  ;;  %s1365_s30 = sld [smem:[#allocation6 + $0x3]] }
  0x19   :  { %v119_v12 = vmul.f32 %v1416_v4, %v118_v11  ;;  %v121_v13 = vmul.f32 %v1420_v5, %v118_v11  ;;  %v123_v16 = vmul.f32 %v1424_v7, %v118_v11  ;;  %1328 = vmatpush.msk.msra.mxu0 %vm74_vm0, %v1661_v20  ;;  %v120_v22 = vmul.f32 %v1417_v15, %v118_v11  ;;  %s1364_s4 = sld [smem:[#allocation2 + $0x3]] }
  0x1a   :  { %v122_v23 = vmul.f32 %v1421_v17, %v118_v11  ;;  %vm71_vm3 = vcmp.eq.s32.totalorder %v1732_v18, %v1711_v9  ;;  %v124_v26 = vmul.f32 %v1425_v19, %v118_v11  ;;  %vm70_vm4 = vcmp.eq.s32.totalorder %v1742_v21, %v1711_v9  ;;  %s1375_s5 = sld [smem:[#allocation6 + $0x4]] }
  0x1b   :  { %135 = vrot.lane.b32.xlu0 %v119_v12, %s1659_s25  ;;  %139 = vrot.lane.b32.xlu1 %v121_v13, %s1659_s25  ;;  %vm69_vm5 = vcmp.eq.s32.totalorder %v1750_v24, %v1711_v9  ;;  %v125_v29 = vmul.f32 %v1428_v27, %v118_v11  ;;  %v126_v30 = vmul.f32 %v1429_v28, %v118_v11  ;;  %v108_v32 = vstv %s107_s2  ;;  %v1838_v13 = vld [vmem:[#allocation8 + $0x38] sm:$0xff]   ;;  %s1374_s6 = sld [smem:[#allocation2 + $0x4]] }
  0x1c   :  { %143 = vrot.lane.b32.xlu2 %v123_v16, %s1659_s25  ;;  %1329 = vmatpush.msk.msra.mxu0 %vm73_vm1, %v1661_v20  ;;  %vm68_vm6 = vcmp.eq.s32.totalorder %v1782_v31, %v1711_v9  ;;  %v109_v33 = vmul.f32 %v1416_v4, %v108_v32  ;;  %v110_v36 = vmul.f32 %v1417_v15, %v108_v32  ;;  %v269_v48 = vstv %s1345_s26  ;;  %s1385_s7 = sld [smem:[#allocation6 + $0x5]] }
  0x1d   :  { %v111_v40 = vmul.f32 %v1420_v5, %v108_v32  ;;  %v112_v42 = vmul.f32 %v1421_v17, %v108_v32  ;;  %v113_v46 = vmul.f32 %v1424_v7, %v108_v32  ;;  %v1432_v52 = vunpack.c.l.bf16 %v1802_v47  ;;  %s1384_s8 = sld [smem:[#allocation2 + $0x5]] }
  0x1e   :  { %1330 = vmatpush.msk.msra.mxu0 %vm72_vm2, %v1661_v20  ;;  %v271_v54 = vmul.f32 %v1433_v50, %v269_v48  ;;  %v272_v55 = vmul.f32 %v1436_v51, %v269_v48  ;;  %v1440_v58 = vunpack.c.l.bf16 %v1809_v53  ;;  %v1441_v59 = vunpack.c.h.bf16 %v1809_v53  ;;  %s1395_s9 = sld [smem:[#allocation6 + $0x6]] }
  0x1f   :  { %v270_v56 = vmul.f32 %v1432_v52, %v269_v48  ;;  %v114_v60 = vmul.f32 %v1425_v19, %v108_v32  ;;  %v115_v1 = vmul.f32 %v1428_v27, %v108_v32  ;;  %v116_v3 = vmul.f32 %v1429_v28, %v108_v32  ;;  %s1394_s10 = sld [smem:[#allocation2 + $0x6]] }
  0x20   :  { %1331 = vmatpush.msk.msra.mxu0 %vm71_vm3, %v1661_v20  ;;  %v274_v62 = vmul.f32 %v1440_v58, %v269_v48  ;;  %v275_v63 = vmul.f32 %v1441_v59, %v269_v48  ;;  %v1437_v11 = vunpack.c.h.bf16 %v1804_v49  ;;  %v1445_v15 = vunpack.c.h.bf16 %v1838_v13  ;;  %s1405_s11 = sld [smem:[#allocation6 + $0x7]] }
  0x21   :  { %v1444_v17 = vunpack.c.l.bf16 %v1838_v13  ;;  %v259_v14 = vstv %s1344_s27  ;;  %s1404_s12 = sld [smem:[#allocation2 + $0x7]] }
  0x22   :  { %1332 = vmatpush.msk.msra.mxu0 %vm70_vm4, %v1661_v20  ;;  %v273_v12 = vmul.f32 %v1437_v11, %v269_v48  ;;  %v277_v16 = vmul.f32 %v1445_v15, %v269_v48  ;;  %v260_v21 = vmul.f32 %v1432_v52, %v259_v14  ;;  %v261_v9 = vmul.f32 %v1433_v50, %v259_v14  ;;  %v1908_v50 = vld [vmem:[#allocation8 + $0x40] sm:$0xff]  }
  0x23   :  { %137 = vrot.lane.b32.xlu0 %v120_v22, %s1659_s25  ;;  %141 = vrot.lane.b32.xlu1 %v122_v23, %s1659_s25  ;;  %v276_v19 = vmul.f32 %v1444_v17, %v269_v48  ;;  %v264_v47 = vmul.f32 %v1440_v58, %v259_v14 }
  0x24   :  { %145 = vrot.lane.b32.xlu2 %v124_v26, %s1659_s25  ;;  %1333 = vmatpush.msk.msra.mxu0 %vm69_vm5, %v1661_v20 }
  0x26   :  { %1334 = vmatpush.msk.msra.mxu0 %vm68_vm6, %v1661_v20 }
  0x28   :  { %1335 = vmatpush.msk.msra.mxu0 %vm67_vm7, %v1661_v20  ;;  %v1662_v20 = vmov 0.0  }
  0x29   :  { %v1320_v22 = vsel %vm67_vm7, 1.0, %v1662_v20  ;;  %v1324_v8 = vsel %vm71_vm3, 1.0, %v1662_v20  ;;  %v1323_v10 = vsel %vm70_vm4, 1.0, %v1662_v20  ;;  %v1321_v18 = vsel %vm68_vm6, 1.0, %v1662_v20 }
  0x2b   :  { %147 = vrot.lane.b32.xlu0 %v125_v29, %s1659_s25  ;;  %149 = vrot.lane.b32.xlu1 %v126_v30, %s1659_s25 }
  0x2c   :  { %286 = vrot.lane.b32.xlu2 %v270_v56, %s1659_s25 }
  0x33   :  { %288 = vrot.lane.b32.xlu0 %v271_v54, %s1659_s25  ;;  %290 = vrot.lane.b32.xlu1 %v272_v55, %s1659_s25  ;;  %v263_v54 = vmul.f32 %v1437_v11, %v259_v14 }
  0x34   :  { %292 = vrot.lane.b32.xlu2 %v273_v12, %s1659_s25 }
  0x3b   :  { %294 = vrot.lane.b32.xlu0 %v274_v62, %s1659_s25  ;;  %296 = vrot.lane.b32.xlu1 %v275_v63, %s1659_s25  ;;  %v1449_v62 = vunpack.c.h.bf16 %v1908_v50  ;;  %v1915_v63 = vld [vmem:[#allocation8 + $0x50] sm:$0xff]  }
  0x3c   :  { %298 = vrot.lane.b32.xlu2 %v276_v19, %s1659_s25  ;;  %v266_v19 = vmul.f32 %v1444_v17, %v259_v14  ;;  %v1456_v17 = vunpack.c.l.bf16 %v1915_v63 }
  0x43   :  { %300 = vrot.lane.b32.xlu0 %v277_v16, %s1659_s25 }
  0x76   :  { %v144_v45 = vpop.permute.xlu2 %143 }
  0x77   :  { %v163_v57 = vadd.f32 %v144_v45, %v113_v46  ;;  %v262_v46 = vmul.f32 %v1436_v51, %v259_v14  ;;  %v1448_v51 = vunpack.c.l.bf16 %v1908_v50 }
  0x7e   :  { %v146_v61 = vpop.permute.xlu2 %145 }
  0x7f   :  { %v164_v0 = vadd.f32 %v146_v61, %v114_v60  ;;  %v1910_v60 = vld [vmem:[#allocation8 + $0x48] sm:$0xff]  }
  0x80   :  { %v1452_v61 = vunpack.c.l.bf16 %v1910_v60 }
  0x8d   :  { %v136_v34 = vpop.permute.xlu0 %135  ;;  %v140_v39 = vpop.permute.xlu1 %139 }
  0x8e   :  { %v159_v35 = vadd.f32 %v136_v34, %v109_v33  ;;  %v161_v41 = vadd.f32 %v140_v39, %v111_v40  ;;  %v1327_v33 = vsel %vm74_vm0, 1.0, %v1662_v20  ;;  %v1326_v34 = vsel %vm73_vm1, 1.0, %v1662_v20 }
  0x8f   :  { %v1322_v40 = vsel %vm69_vm5, 1.0, %v1662_v20 }
  0x90   :  { %1336 = vmatmul.msk.f32.vlgmr.msra.gmra.mxu0 %vm167_vm8, %v159_v35 }
  0x95   :  { %v138_v37 = vpop.permute.xlu0 %137  ;;  %v142_v43 = vpop.permute.xlu1 %141 }
  0x96   :  { %v160_v38 = vadd.f32 %v138_v37, %v110_v36  ;;  %v162_v44 = vadd.f32 %v142_v43, %v112_v42  ;;  %v1325_v36 = vsel %vm72_vm2, 1.0, %v1662_v20  ;;  %v287_v43 = vpop.permute.xlu2 %286 }
  0x97   :  { %v310_v24 = vadd.f32 %v287_v43, %v260_v21  ;;  %v409_v43 = vstv %s1354_s29 }
  0x98   :  { %1337 = vmatmul.msk.f32.gmra.mxu0 %vm167_vm8, %v160_v38 }
  0x9d   :  { %v148_v2 = vpop.permute.xlu0 %147  ;;  %v150_v5 = vpop.permute.xlu1 %149 }
  0x9e   :  { %v165_v4 = vadd.f32 %v148_v2, %v115_v1  ;;  %v166_v7 = vadd.f32 %v150_v5, %v116_v3  ;;  %v293_v55 = vpop.permute.xlu2 %292  ;;  %v1457_v3 = vunpack.c.h.bf16 %v1915_v63  ;;  %v265_v5 = vmul.f32 %v1441_v59, %v259_v14 }
  0x9f   :  { %v313_v56 = vadd.f32 %v293_v55, %v263_v54  ;;  %v267_v59 = vmul.f32 %v1445_v15, %v259_v14  ;;  %v414_v55 = vmul.f32 %v1456_v17, %v409_v43 }
  0xa0   :  { %1338 = vmatmul.msk.f32.gmra.mxu0 %vm167_vm8, %v161_v41 }
  0xa5   :  { %v289_v31 = vpop.permute.xlu0 %288  ;;  %v291_v48 = vpop.permute.xlu1 %290 }
  0xa6   :  { %v311_v45 = vadd.f32 %v289_v31, %v261_v9  ;;  %v312_v52 = vadd.f32 %v291_v48, %v262_v46  ;;  %v299_v20 = vpop.permute.xlu2 %298 }
  0xa7   :  { %v316_v53 = vadd.f32 %v299_v20, %v266_v19 }
  0xa8   :  { %1339 = vmatmul.msk.f32.gmra.mxu0 %vm167_vm8, %v162_v44 }
  0xad   :  { %v295_v49 = vpop.permute.xlu0 %294 }
  0xae   :  { %v314_v2 = vadd.f32 %v295_v49, %v264_v47  ;;  %v569_v47 = vstv %s1365_s30 }
  0xb0   :  { %1340 = vmatmul.msk.f32.gmra.mxu0 %vm167_vm8, %v163_v57  ;;  %v419_v57 = vstv %s1355_s28 }
  0xb1   :  { %v422_v1 = vmul.f32 %v1452_v61, %v419_v57  ;;  %v421_v58 = vmul.f32 %v1449_v62, %v419_v57  ;;  %v425_v12 = vmul.f32 %v1457_v3, %v419_v57 }
  0xb3   :  { %440 = vrot.lane.b32.xlu0 %v422_v1, %s1659_s25  ;;  %438 = vrot.lane.b32.xlu2 %v421_v58, %s1659_s25 }
  0xb8   :  { %1341 = vmatmul.msk.f32.gmra.mxu0 %vm167_vm8, %v164_v0  ;;  %v420_v0 = vmul.f32 %v1448_v51, %v419_v57 }
  0xba   :  { %436 = vrot.lane.b32.xlu1 %v420_v0, %s1659_s25 }
  0xbb   :  { %446 = vrot.lane.b32.xlu0 %v425_v12, %s1659_s25 }
  0xc0   :  { %1342 = vmatmul.msk.f32.gmra.mxu0 %vm167_vm8, %v165_v4  ;;  %v1453_v4 = vunpack.c.h.bf16 %v1910_v60 }
  0xc2   :  { %v423_v11 = vmul.f32 %v1453_v4, %v419_v57 }
  0xc4   :  { %442 = vrot.lane.b32.xlu1 %v423_v11, %s1659_s25 }
  0xc8   :  { %1343 = vmatmul.msk.f32.gmra.mxu0 %vm167_vm8, %v166_v7  ;;  %v297_v7 = vpop.permute.xlu1 %296 }
  0xc9   :  { %v315_v16 = vadd.f32 %v297_v7, %v265_v5  ;;  %v415_v5 = vmul.f32 %v1457_v3, %v409_v43 }
 0x10d   :  { %v209_v23 = vpop.f32.mrf.mxu0 }
 0x10e   :  { %v1851_v25 = vadd.f32 %v1320_v22, %v209_v23  ;;  %v301_v22 = vpop.permute.xlu0 %300 }
 0x10f   :  { %v317_v23 = vadd.f32 %v301_v22, %v267_v59  ;;  %v2030_v22 = vld [vmem:[#allocation8 + $0x78] sm:$0xff]  }
 0x115   :  { %v212_v26 = vpop.f32.mrf.mxu0 }
 0x116   :  { %v1893_v44 = vadd.f32 %v1321_v18, %v212_v26  ;;  %v1942_v26 = vld [vmem:[#allocation8 + $0x58] sm:$0xff]  }
 0x117   :  { %v1461_v15 = vunpack.c.h.bf16 %v1942_v26 }
 0x119   :  { %v417_v3 = vmul.f32 %v1461_v15, %v409_v43 }
 0x11d   :  { %v215_v27 = vpop.f32.mrf.mxu0 }
 0x11e   :  { %v1890_v42 = vadd.f32 %v1322_v40, %v215_v27  ;;  %v1460_v27 = vunpack.c.l.bf16 %v1942_v26 }
 0x120   :  { %v416_v19 = vmul.f32 %v1460_v27, %v409_v43 }
 0x125   :  { %v218_v28 = vpop.f32.mrf.mxu0  ;;  %v441_v46 = vpop.permute.xlu0 %440 }
 0x126   :  { %v1882_v41 = vadd.f32 %v1323_v10, %v218_v28  ;;  %v426_v28 = vmul.f32 %v1460_v27, %v419_v57  ;;  %v1477_v27 = vunpack.c.h.bf16 %v2030_v22 }
 0x128   :  { %448 = vrot.lane.b32.xlu1 %v426_v28, %s1659_s25 }
 0x12d   :  { %v221_v29 = vpop.f32.mrf.mxu0  ;;  %v447_v7 = vpop.permute.xlu0 %446 }
 0x12e   :  { %v1876_v39 = vadd.f32 %v1324_v8, %v221_v29  ;;  %v424_v29 = vmul.f32 %v1456_v17, %v419_v57  ;;  %v577_v17 = vmul.f32 %v1477_v27, %v569_v47 }
 0x130   :  { %444 = vrot.lane.b32.xlu2 %v424_v29, %s1659_s25 }
 0x135   :  { %v224_v30 = vpop.f32.mrf.mxu0 }
 0x136   :  { %v1870_v38 = vadd.f32 %v1325_v36, %v224_v30  ;;  %v427_v30 = vmul.f32 %v1461_v15, %v419_v57 }
 0x138   :  { %450 = vrot.lane.b32.xlu2 %v427_v30, %s1659_s25 }
 0x13d   :  { %v227_v32 = vpop.f32.mrf.mxu0 }
 0x13e   :  { %v1864_v37 = vadd.f32 %v1326_v34, %v227_v32 }
 0x145   :  { %v230_v6 = vpop.f32.mrf.mxu0 }
 0x146   :  { %v1859_v35 = vadd.f32 %v1327_v33, %v230_v6 }
 0x148   :  { %350 = vmatpush.msra.mxu1 %v1859_v35 }
 0x14a   :  { %351 = vmatpush.msra.mxu1 %v1864_v37 }
 0x14c   :  { %352 = vmatpush.msra.mxu1 %v1870_v38 }
 0x14e   :  { %353 = vmatpush.msra.mxu1 %v1876_v39 }
 0x150   :  { %354 = vmatpush.msra.mxu1 %v1882_v41 }
 0x152   :  { %355 = vmatpush.msra.mxu1 %v1890_v42 }
 0x154   :  { %356 = vmatpush.msra.mxu1 %v1893_v44 }
 0x156   :  { %357 = vmatpush.msra.mxu1 %v1851_v25 }
 0x157   :  { %1346 = vmatmul.msk.f32.vlgmr.msra.gmra.mxu1 %vm167_vm8, %v310_v24 }
 0x15f   :  { %1347 = vmatmul.msk.f32.gmra.mxu1 %vm167_vm8, %v311_v45 }
 0x167   :  { %1348 = vmatmul.msk.f32.gmra.mxu1 %vm167_vm8, %v312_v52 }
 0x16f   :  { %1349 = vmatmul.msk.f32.gmra.mxu1 %vm167_vm8, %v313_v56  ;;  %v1996_v56 = vld [vmem:[#allocation8 + $0x60] sm:$0xff]  }
 0x170   :  { %v1464_v57 = vunpack.c.l.bf16 %v1996_v56  ;;  %v1465_v49 = vunpack.c.h.bf16 %v1996_v56  ;;  %v2090_v56 = vld [vmem:[#allocation8 + $0x88] sm:$0xff]  }
 0x172   :  { %v571_v0 = vmul.f32 %v1465_v49, %v569_v47 }
 0x174   :  { %588 = vrot.lane.b32.xlu1 %v571_v0, %s1659_s25 }
 0x177   :  { %1350 = vmatmul.msk.f32.gmra.mxu1 %vm167_vm8, %v314_v2 }
 0x17f   :  { %1351 = vmatmul.msk.f32.gmra.mxu1 %vm167_vm8, %v315_v16  ;;  %v465_v16 = vadd.f32 %v447_v7, %v415_v5 }
 0x187   :  { %1352 = vmatmul.msk.f32.gmra.mxu1 %vm167_vm8, %v316_v53 }
 0x18f   :  { %1353 = vmatmul.msk.f32.gmra.mxu1 %vm167_vm8, %v317_v23  ;;  %v1476_v23 = vunpack.c.l.bf16 %v2030_v22 }
 0x191   :  { %v576_v28 = vmul.f32 %v1476_v23, %v569_v47 }
 0x1d4   :  { %v359_v13 = vpop.f32.mrf.mxu1 }
 0x1d5   :  { %v1982_v31 = vadd.f32 %v359_v13, %v1851_v25  ;;  %v413_v25 = vmul.f32 %v1453_v4, %v409_v43 }
 0x1dc   :  { %v362_v32 = vpop.f32.mrf.mxu1 }
 0x1dd   :  { %v1978_v9 = vadd.f32 %v362_v32, %v1893_v44  ;;  %v412_v44 = vmul.f32 %v1452_v61, %v409_v43  ;;  %v2002_v61 = vld [vmem:[#allocation8 + $0x70] sm:$0xff]  }
 0x1de   :  { %v1472_v4 = vunpack.c.l.bf16 %v2002_v61  ;;  %v1473_v26 = vunpack.c.h.bf16 %v2002_v61 }
 0x1df   :  { %v462_v48 = vadd.f32 %v441_v46, %v412_v44 }
 0x1e0   :  { %v574_v12 = vmul.f32 %v1472_v4, %v569_v47  ;;  %v575_v29 = vmul.f32 %v1473_v26, %v569_v47 }
 0x1e2   :  { %594 = vrot.lane.b32.xlu1 %v574_v12, %s1659_s25 }
 0x1e4   :  { %v365_v33 = vpop.f32.mrf.mxu1 }
 0x1ea   :  { %600 = vrot.lane.b32.xlu1 %v577_v17, %s1659_s25 }
 0x1ec   :  { %v368_v34 = vpop.f32.mrf.mxu1 }
 0x1ed   :  { %v1970_v24 = vadd.f32 %v368_v34, %v1882_v41  ;;  %v411_v41 = vmul.f32 %v1449_v62, %v409_v43  ;;  %v570_v62 = vmul.f32 %v1464_v57, %v569_v47 }
 0x1ef   :  { %586 = vrot.lane.b32.xlu0 %v570_v62, %s1659_s25 }
 0x1f4   :  { %v371_v6 = vpop.f32.mrf.mxu1 }
 0x1f5   :  { %v1966_v21 = vadd.f32 %v371_v6, %v1876_v39 }
 0x1fc   :  { %v374_v36 = vpop.f32.mrf.mxu1 }
 0x1fd   :  { %v1962_v18 = vadd.f32 %v374_v36, %v1870_v38  ;;  %v437_v38 = vpop.permute.xlu1 %436 }
 0x204   :  { %v377_v8 = vpop.f32.mrf.mxu1 }
 0x205   :  { %v1958_v40 = vadd.f32 %v377_v8, %v1864_v37  ;;  %v1974_v37 = vadd.f32 %v365_v33, %v1890_v42  ;;  %v439_v42 = vpop.permute.xlu2 %438  ;;  %v443_v52 = vpop.permute.xlu1 %442 }
 0x206   :  { %v461_v45 = vadd.f32 %v439_v42, %v411_v41  ;;  %v463_v54 = vadd.f32 %v443_v52, %v413_v25 }
 0x20c   :  { %v380_v10 = vpop.f32.mrf.mxu1 }
 0x20d   :  { %v1955_v14 = vadd.f32 %v380_v10, %v1859_v35  ;;  %v410_v35 = vmul.f32 %v1448_v51, %v409_v43  ;;  %v445_v50 = vpop.permute.xlu2 %444  ;;  %v2000_v51 = vld [vmem:[#allocation8 + $0x68] sm:$0xff]   ;;  %v449_v20 = vpop.permute.xlu1 %448 }
 0x20e   :  { %v1468_v60 = vunpack.c.l.bf16 %v2000_v51  ;;  %v464_v1 = vadd.f32 %v445_v50, %v414_v55  ;;  %v1469_v2 = vunpack.c.h.bf16 %v2000_v51  ;;  %v466_v63 = vadd.f32 %v449_v20, %v416_v19  ;;  %v2095_v51 = vld [vmem:[#allocation8 + $0x90] sm:$0xff]  }
 0x20f   :  { %500 = vmatpush.msra.mxu2 %v1955_v14  ;;  %v460_v39 = vadd.f32 %v437_v38, %v410_v35  ;;  %v559_v38 = vstv %s1364_s4  ;;  %v719_v55 = vstv %s1375_s5 }
 0x210   :  { %v572_v58 = vmul.f32 %v1468_v60, %v569_v47  ;;  %v573_v11 = vmul.f32 %v1469_v2, %v569_v47  ;;  %v564_v52 = vmul.f32 %v1472_v4, %v559_v38  ;;  %v565_v4 = vmul.f32 %v1473_v26, %v559_v38 }
 0x211   :  { %501 = vmatpush.msra.mxu2 %v1958_v40  ;;  %v567_v20 = vmul.f32 %v1477_v27, %v559_v38 }
 0x212   :  { %590 = vrot.lane.b32.xlu2 %v572_v58, %s1659_s25  ;;  %592 = vrot.lane.b32.xlu0 %v573_v11, %s1659_s25  ;;  %v1488_v58 = vunpack.c.l.bf16 %v2095_v51 }
 0x213   :  { %502 = vmatpush.msra.mxu2 %v1962_v18 }
 0x214   :  { %v724_v7 = vmul.f32 %v1488_v58, %v719_v55 }
 0x215   :  { %503 = vmatpush.msra.mxu2 %v1966_v21  ;;  %v451_v53 = vpop.permute.xlu2 %450 }
 0x216   :  { %v467_v59 = vadd.f32 %v451_v53, %v417_v3  ;;  %v1485_v53 = vunpack.c.h.bf16 %v2090_v56 }
 0x217   :  { %504 = vmatpush.msra.mxu2 %v1970_v24 }
 0x219   :  { %505 = vmatpush.msra.mxu2 %v1974_v37 }
 0x21a   :  { %598 = vrot.lane.b32.xlu0 %v576_v28, %s1659_s25  ;;  %596 = vrot.lane.b32.xlu2 %v575_v29, %s1659_s25  ;;  %v2124_v28 = vld [vmem:[#allocation8 + $0x98] sm:$0xff]  }
 0x21b   :  { %506 = vmatpush.msra.mxu2 %v1978_v9  ;;  %v1492_v22 = vunpack.c.l.bf16 %v2124_v28 }
 0x21d   :  { %507 = vmatpush.msra.mxu2 %v1982_v31  ;;  %v726_v27 = vmul.f32 %v1492_v22, %v719_v55 }
 0x21e   :  { %1356 = vmatmul.msk.f32.vlgmr.msra.gmra.mxu2 %vm167_vm8, %v460_v39 }
 0x226   :  { %1357 = vmatmul.msk.f32.gmra.mxu2 %vm167_vm8, %v461_v45 }
 0x22e   :  { %1358 = vmatmul.msk.f32.gmra.mxu2 %vm167_vm8, %v462_v48 }
 0x236   :  { %1359 = vmatmul.msk.f32.gmra.mxu2 %vm167_vm8, %v463_v54  ;;  %v2088_v54 = vld [vmem:[#allocation8 + $0x80] sm:$0xff]  }
 0x237   :  { %v1481_v50 = vunpack.c.h.bf16 %v2088_v54 }
 0x23e   :  { %1360 = vmatmul.msk.f32.gmra.mxu2 %vm167_vm8, %v464_v1 }
 0x246   :  { %1361 = vmatmul.msk.f32.gmra.mxu2 %vm167_vm8, %v465_v16  ;;  %v566_v16 = vmul.f32 %v1476_v23, %v559_v38  ;;  %v1493_v23 = vunpack.c.h.bf16 %v2124_v28 }
 0x248   :  { %v727_v17 = vmul.f32 %v1493_v23, %v719_v55 }
 0x24e   :  { %1362 = vmatmul.msk.f32.gmra.mxu2 %vm167_vm8, %v466_v63 }
 0x256   :  { %1363 = vmatmul.msk.f32.gmra.mxu2 %vm167_vm8, %v467_v59  ;;  %v723_v59 = vmul.f32 %v1485_v53, %v719_v55 }
 0x26c   :  { %v591_v44 = vpop.permute.xlu2 %590 }
 0x274   :  { %v597_v5 = vpop.permute.xlu2 %596 }
 0x275   :  { %v615_v12 = vadd.f32 %v597_v5, %v565_v4 }
 0x2a1   :  { %v509_v13 = vpop.f32.mrf.mxu2 }
 0x2a2   :  { %v2072_v42 = vadd.f32 %v509_v13, %v1982_v31  ;;  %v563_v31 = vmul.f32 %v1469_v2, %v559_v38  ;;  %v1489_v2 = vunpack.c.h.bf16 %v2095_v51 }
 0x2a4   :  { %v725_v11 = vmul.f32 %v1489_v2, %v719_v55 }
 0x2a9   :  { %v512_v15 = vpop.f32.mrf.mxu2 }
 0x2aa   :  { %v2068_v41 = vadd.f32 %v512_v15, %v1978_v9  ;;  %v562_v9 = vmul.f32 %v1468_v60, %v559_v38  ;;  %v721_v60 = vmul.f32 %v1481_v50, %v719_v55 }
 0x2ac   :  { %v612_v46 = vadd.f32 %v591_v44, %v562_v9  ;;  %738 = vrot.lane.b32.xlu0 %v721_v60, %s1659_s25 }
 0x2b1   :  { %v515_v30 = vpop.f32.mrf.mxu2 }
 0x2b4   :  { %744 = vrot.lane.b32.xlu0 %v724_v7, %s1659_s25 }
 0x2b9   :  { %v518_v32 = vpop.f32.mrf.mxu2 }
 0x2ba   :  { %v2060_v39 = vadd.f32 %v518_v32, %v1970_v24  ;;  %v561_v24 = vmul.f32 %v1465_v49, %v559_v38  ;;  %v1480_v49 = vunpack.c.l.bf16 %v2088_v54  ;;  %v2178_v54 = vld [vmem:[#allocation8 + $0xa8] sm:$0xff]  }
 0x2bc   :  { %v720_v0 = vmul.f32 %v1480_v49, %v719_v55  ;;  %750 = vrot.lane.b32.xlu0 %v727_v17, %s1659_s25 }
 0x2be   :  { %736 = vrot.lane.b32.xlu2 %v720_v0, %s1659_s25 }
 0x2c1   :  { %v521_v33 = vpop.f32.mrf.mxu2 }
 0x2c2   :  { %v2056_v35 = vadd.f32 %v521_v33, %v1966_v21 }
 0x2c6   :  { %742 = vrot.lane.b32.xlu2 %v723_v59, %s1659_s25 }
 0x2c9   :  { %v524_v34 = vpop.f32.mrf.mxu2 }
 0x2ca   :  { %v2052_v43 = vadd.f32 %v524_v34, %v1962_v18  ;;  %v587_v18 = vpop.permute.xlu0 %586 }
 0x2ce   :  { %748 = vrot.lane.b32.xlu2 %v726_v27, %s1659_s25 }
 0x2d1   :  { %v527_v6 = vpop.f32.mrf.mxu2 }
 0x2d2   :  { %v2048_v10 = vadd.f32 %v527_v6, %v1958_v40  ;;  %v2064_v40 = vadd.f32 %v515_v30, %v1974_v37  ;;  %v589_v37 = vpop.permute.xlu1 %588  ;;  %v593_v48 = vpop.permute.xlu0 %592 }
 0x2d3   :  { %v611_v45 = vadd.f32 %v589_v37, %v561_v24  ;;  %v613_v25 = vadd.f32 %v593_v48, %v563_v31 }
 0x2d9   :  { %v530_v36 = vpop.f32.mrf.mxu2 }
 0x2da   :  { %v2045_v8 = vadd.f32 %v530_v36, %v1955_v14  ;;  %v560_v14 = vmul.f32 %v1464_v57, %v559_v38  ;;  %v595_v47 = vpop.permute.xlu1 %594  ;;  %v1484_v57 = vunpack.c.l.bf16 %v2090_v56  ;;  %v599_v19 = vpop.permute.xlu0 %598 }
 0x2db   :  { %v614_v1 = vadd.f32 %v595_v47, %v564_v52  ;;  %v616_v61 = vadd.f32 %v599_v19, %v566_v16  ;;  %v869_v52 = vstv %s1385_s7  ;;  %v1500_v47 = vunpack.c.l.bf16 %v2178_v54 }
 0x2dc   :  { %650 = vmatpush.msra.mxu3 %v2045_v8  ;;  %v610_v21 = vadd.f32 %v587_v18, %v560_v14  ;;  %v722_v62 = vmul.f32 %v1484_v57, %v719_v55  ;;  %v709_v18 = vstv %s1374_s6 }
 0x2dd   :  { %v714_v48 = vmul.f32 %v1488_v58, %v709_v18  ;;  %v872_v60 = vmul.f32 %v1500_v47, %v869_v52  ;;  %v715_v4 = vmul.f32 %v1489_v2, %v709_v18  ;;  %v716_v16 = vmul.f32 %v1492_v22, %v709_v18 }
 0x2de   :  { %651 = vmatpush.msra.mxu3 %v2048_v10  ;;  %740 = vrot.lane.b32.xlu1 %v722_v62, %s1659_s25  ;;  %v717_v2 = vmul.f32 %v1493_v23, %v709_v18 }
 0x2df   :  { %890 = vrot.lane.b32.xlu0 %v872_v60, %s1659_s25 }
 0x2e0   :  { %652 = vmatpush.msra.mxu3 %v2052_v43 }
 0x2e2   :  { %653 = vmatpush.msra.mxu3 %v2056_v35  ;;  %v601_v63 = vpop.permute.xlu1 %600 }
 0x2e3   :  { %v617_v3 = vadd.f32 %v601_v63, %v567_v20  ;;  %v2210_v63 = vld [vmem:[#allocation8 + $0xb8] sm:$0xff]  }
 0x2e4   :  { %654 = vmatpush.msra.mxu3 %v2060_v39  ;;  %v1509_v23 = vunpack.c.h.bf16 %v2210_v63 }
 0x2e6   :  { %655 = vmatpush.msra.mxu3 %v2064_v40  ;;  %746 = vrot.lane.b32.xlu1 %v725_v11, %s1659_s25  ;;  %v877_v22 = vmul.f32 %v1509_v23, %v869_v52 }
 0x2e8   :  { %656 = vmatpush.msra.mxu3 %v2068_v41 }
 0x2ea   :  { %657 = vmatpush.msra.mxu3 %v2072_v42 }
 0x2eb   :  { %1366 = vmatmul.msk.f32.vlgmr.msra.gmra.mxu3 %vm167_vm8, %v610_v21 }
 0x2f3   :  { %1367 = vmatmul.msk.f32.gmra.mxu3 %vm167_vm8, %v611_v45 }
 0x2fb   :  { %1368 = vmatmul.msk.f32.gmra.mxu3 %vm167_vm8, %v612_v46 }
 0x303   :  { %1369 = vmatmul.msk.f32.gmra.mxu3 %vm167_vm8, %v613_v25  ;;  %v2176_v25 = vld [vmem:[#allocation8 + $0xa0] sm:$0xff]  }
 0x304   :  { %v1496_v56 = vunpack.c.l.bf16 %v2176_v25 }
 0x30b   :  { %1370 = vmatmul.msk.f32.gmra.mxu3 %vm167_vm8, %v614_v1  ;;  %v1501_v1 = vunpack.c.h.bf16 %v2178_v54 }
 0x30d   :  { %v873_v7 = vmul.f32 %v1501_v1, %v869_v52 }
 0x313   :  { %1371 = vmatmul.msk.f32.gmra.mxu3 %vm167_vm8, %v615_v12 }
 0x31b   :  { %1372 = vmatmul.msk.f32.gmra.mxu3 %vm167_vm8, %v616_v61 }
 0x323   :  { %1373 = vmatmul.msk.f32.gmra.mxu3 %vm167_vm8, %v617_v3  ;;  %v1508_v3 = vunpack.c.l.bf16 %v2210_v63 }
 0x350   :  { %v741_v9 = vpop.permute.xlu1 %740 }
 0x358   :  { %v747_v5 = vpop.permute.xlu1 %746 }
 0x359   :  { %v765_v12 = vadd.f32 %v747_v5, %v715_v4 }
 0x36e   :  { %v659_v26 = vpop.f32.mrf.mxu3 }
 0x36f   :  { %v2162_v37 = vadd.f32 %v659_v26, %v2072_v42  ;;  %v713_v42 = vmul.f32 %v1485_v53, %v709_v18  ;;  %v876_v53 = vmul.f32 %v1508_v3, %v869_v52 }
 0x376   :  { %v662_v29 = vpop.f32.mrf.mxu3 }
 0x377   :  { %v2158_v24 = vadd.f32 %v662_v29, %v2068_v41  ;;  %v712_v41 = vmul.f32 %v1484_v57, %v709_v18  ;;  %v2183_v57 = vld [vmem:[#allocation8 + $0xb0] sm:$0xff]  }
 0x378   :  { %v1505_v58 = vunpack.c.h.bf16 %v2183_v57  ;;  %v1504_v59 = vunpack.c.l.bf16 %v2183_v57 }
 0x379   :  { %v762_v44 = vadd.f32 %v741_v9, %v712_v41 }
 0x37a   :  { %v875_v11 = vmul.f32 %v1505_v58, %v869_v52  ;;  %v874_v17 = vmul.f32 %v1504_v59, %v869_v52 }
 0x37c   :  { %896 = vrot.lane.b32.xlu0 %v875_v11, %s1659_s25 }
 0x37e   :  { %v665_v13 = vpop.f32.mrf.mxu3 }
 0x386   :  { %v668_v15 = vpop.f32.mrf.mxu3 }
 0x387   :  { %v2150_v21 = vadd.f32 %v668_v15, %v2060_v39  ;;  %v711_v39 = vmul.f32 %v1481_v50, %v709_v18  ;;  %v1497_v50 = vunpack.c.h.bf16 %v2176_v25 }
 0x389   :  { %v871_v62 = vmul.f32 %v1497_v50, %v869_v52 }
 0x38b   :  { %888 = vrot.lane.b32.xlu2 %v871_v62, %s1659_s25 }
 0x38e   :  { %v671_v30 = vpop.f32.mrf.mxu3 }
 0x38f   :  { %v2146_v14 = vadd.f32 %v671_v30, %v2056_v35 }
 0x393   :  { %894 = vrot.lane.b32.xlu2 %v874_v17, %s1659_s25 }
 0x396   :  { %v674_v32 = vpop.f32.mrf.mxu3 }
 0x397   :  { %v2142_v38 = vadd.f32 %v674_v32, %v2052_v43  ;;  %v737_v43 = vpop.permute.xlu2 %736 }
 0x39b   :  { %900 = vrot.lane.b32.xlu2 %v877_v22, %s1659_s25 }
 0x39e   :  { %v677_v33 = vpop.f32.mrf.mxu3 }
 0x39f   :  { %v2138_v36 = vadd.f32 %v677_v33, %v2048_v10  ;;  %v2154_v10 = vadd.f32 %v665_v13, %v2064_v40  ;;  %v739_v40 = vpop.permute.xlu0 %738  ;;  %v743_v46 = vpop.permute.xlu2 %742 }
 0x3a0   :  { %v761_v45 = vadd.f32 %v739_v40, %v711_v39  ;;  %v763_v31 = vadd.f32 %v743_v46, %v713_v42 }
 0x3a6   :  { %v680_v34 = vpop.f32.mrf.mxu3 }
 0x3a7   :  { %v2135_v6 = vadd.f32 %v680_v34, %v2045_v8  ;;  %v710_v8 = vmul.f32 %v1480_v49, %v709_v18  ;;  %v745_v55 = vpop.permute.xlu0 %744  ;;  %v870_v49 = vmul.f32 %v1496_v56, %v869_v52  ;;  %v749_v19 = vpop.permute.xlu2 %748 }
 0x3a8   :  { %v764_v0 = vadd.f32 %v745_v55, %v714_v48  ;;  %v766_v51 = vadd.f32 %v749_v19, %v716_v16  ;;  %v1019_v48 = vstv %s1395_s9 }
 0x3a9   :  { %800 = vmatpush.msrb.mxu0 %v2135_v6  ;;  %v760_v35 = vadd.f32 %v737_v43, %v710_v8  ;;  %886 = vrot.lane.b32.xlu1 %v870_v49, %s1659_s25  ;;  %v859_v43 = vstv %s1384_s8 }
 0x3aa   :  { %v864_v46 = vmul.f32 %v1504_v59, %v859_v43  ;;  %v865_v4 = vmul.f32 %v1505_v58, %v859_v43  ;;  %v866_v16 = vmul.f32 %v1508_v3, %v859_v43  ;;  %v867_v58 = vmul.f32 %v1509_v23, %v859_v43 }
 0x3ab   :  { %801 = vmatpush.msrb.mxu0 %v2138_v36 }
 0x3ad   :  { %802 = vmatpush.msrb.mxu0 %v2142_v38 }
 0x3af   :  { %803 = vmatpush.msrb.mxu0 %v2146_v14  ;;  %v751_v61 = vpop.permute.xlu0 %750 }
 0x3b0   :  { %v767_v20 = vadd.f32 %v751_v61, %v717_v2  ;;  %v2298_v61 = vld [vmem:[#allocation8 + $0xd8] sm:$0xff]  }
 0x3b1   :  { %804 = vmatpush.msrb.mxu0 %v2150_v21  ;;  %892 = vrot.lane.b32.xlu1 %v873_v7, %s1659_s25  ;;  %v1525_v3 = vunpack.c.h.bf16 %v2298_v61 }
 0x3b3   :  { %805 = vmatpush.msrb.mxu0 %v2154_v10  ;;  %v1027_v59 = vmul.f32 %v1525_v3, %v1019_v48 }
 0x3b5   :  { %806 = vmatpush.msrb.mxu0 %v2158_v24 }
 0x3b7   :  { %807 = vmatpush.msrb.mxu0 %v2162_v37  ;;  %v891_v41 = vpop.permute.xlu0 %890 }
 0x3b8   :  { %1376 = vmatmul.msk.f32.vlgmr.msrb.gmra.mxu0 %vm167_vm8, %v760_v35 }
 0x3b9   :  { %898 = vrot.lane.b32.xlu1 %v876_v53, %s1659_s25 }
 0x3c0   :  { %1377 = vmatmul.msk.f32.gmra.mxu0 %vm167_vm8, %v761_v45 }
 0x3c8   :  { %1378 = vmatmul.msk.f32.gmra.mxu0 %vm167_vm8, %v762_v44 }
 0x3d0   :  { %1379 = vmatmul.msk.f32.gmra.mxu0 %vm167_vm8, %v763_v31  ;;  %v2264_v31 = vld [vmem:[#allocation8 + $0xc0] sm:$0xff]  }
 0x3d1   :  { %v1512_v52 = vunpack.c.l.bf16 %v2264_v31  ;;  %v1513_v55 = vunpack.c.h.bf16 %v2264_v31  ;;  %v2358_v31 = vld [vmem:[#allocation8 + $0xe8] sm:$0xff]  }
 0x3d3   :  { %v1021_v49 = vmul.f32 %v1513_v55, %v1019_v48 }
 0x3d5   :  { %1038 = vrot.lane.b32.xlu1 %v1021_v49, %s1659_s25 }
 0x3d8   :  { %1380 = vmatmul.msk.f32.gmra.mxu0 %vm167_vm8, %v764_v0 }
 0x3e0   :  { %1381 = vmatmul.msk.f32.gmra.mxu0 %vm167_vm8, %v765_v12 }
 0x3e8   :  { %1382 = vmatmul.msk.f32.gmra.mxu0 %vm167_vm8, %v766_v51 }
 0x3ee   :  { %v897_v5 = vpop.permute.xlu0 %896 }
 0x3ef   :  { %v915_v12 = vadd.f32 %v897_v5, %v865_v4 }
 0x3f0   :  { %1383 = vmatmul.msk.f32.gmra.mxu0 %vm167_vm8, %v767_v20  ;;  %v1524_v20 = vunpack.c.l.bf16 %v2298_v61 }
 0x3f2   :  { %v1026_v53 = vmul.f32 %v1524_v20, %v1019_v48 }
 0x435   :  { %v809_v28 = vpop.f32.mrf.mxu0 }
 0x436   :  { %v2250_v40 = vadd.f32 %v809_v28, %v2162_v37  ;;  %v863_v37 = vmul.f32 %v1501_v1, %v859_v43 }
 0x43d   :  { %v812_v27 = vpop.f32.mrf.mxu0 }
 0x43e   :  { %v2246_v39 = vadd.f32 %v812_v27, %v2158_v24  ;;  %v862_v24 = vmul.f32 %v1500_v47, %v859_v43  ;;  %v2270_v47 = vld [vmem:[#allocation8 + $0xd0] sm:$0xff]  }
 0x43f   :  { %v1520_v1 = vunpack.c.l.bf16 %v2270_v47  ;;  %v1521_v63 = vunpack.c.h.bf16 %v2270_v47 }
 0x440   :  { %v912_v9 = vadd.f32 %v891_v41, %v862_v24 }
 0x441   :  { %v1024_v11 = vmul.f32 %v1520_v1, %v1019_v48  ;;  %v1025_v17 = vmul.f32 %v1521_v63, %v1019_v48 }
 0x443   :  { %1044 = vrot.lane.b32.xlu1 %v1024_v11, %s1659_s25 }
 0x445   :  { %v815_v26 = vpop.f32.mrf.mxu0 }
 0x44b   :  { %1050 = vrot.lane.b32.xlu1 %v1027_v59, %s1659_s25 }
 0x44d   :  { %v818_v29 = vpop.f32.mrf.mxu0 }
 0x44e   :  { %v2238_v35 = vadd.f32 %v818_v29, %v2150_v21  ;;  %v861_v21 = vmul.f32 %v1497_v50, %v859_v43  ;;  %v1020_v50 = vmul.f32 %v1512_v52, %v1019_v48 }
 0x450   :  { %1036 = vrot.lane.b32.xlu0 %v1020_v50, %s1659_s25 }
 0x455   :  { %v821_v13 = vpop.f32.mrf.mxu0 }
 0x456   :  { %v2234_v8 = vadd.f32 %v821_v13, %v2146_v14 }
 0x45d   :  { %v824_v15 = vpop.f32.mrf.mxu0 }
 0x45e   :  { %v2230_v18 = vadd.f32 %v824_v15, %v2142_v38  ;;  %v887_v38 = vpop.permute.xlu1 %886 }
 0x465   :  { %v827_v30 = vpop.f32.mrf.mxu0 }
 0x466   :  { %v2226_v34 = vadd.f32 %v827_v30, %v2138_v36  ;;  %v2242_v36 = vadd.f32 %v815_v26, %v2154_v10  ;;  %v889_v10 = vpop.permute.xlu2 %888  ;;  %v893_v44 = vpop.permute.xlu1 %892 }
 0x467   :  { %v911_v45 = vadd.f32 %v889_v10, %v861_v21  ;;  %v913_v42 = vadd.f32 %v893_v44, %v863_v37 }
 0x46d   :  { %v830_v32 = vpop.f32.mrf.mxu0 }
 0x46e   :  { %v2223_v33 = vadd.f32 %v830_v32, %v2135_v6  ;;  %v860_v6 = vmul.f32 %v1496_v56, %v859_v43  ;;  %v895_v25 = vpop.permute.xlu2 %894  ;;  %v2268_v56 = vld [vmem:[#allocation8 + $0xc8] sm:$0xff]   ;;  %v899_v19 = vpop.permute.xlu1 %898 }
 0x46f   :  { %v1516_v54 = vunpack.c.l.bf16 %v2268_v56  ;;  %v914_v60 = vadd.f32 %v895_v25, %v864_v46  ;;  %v1517_v0 = vunpack.c.h.bf16 %v2268_v56  ;;  %v916_v57 = vadd.f32 %v899_v19, %v866_v16  ;;  %v2363_v56 = vld [vmem:[#allocation8 + $0xf0] sm:$0xff]  }
 0x470   :  { %950 = vmatpush.msrb.mxu1 %v2223_v33  ;;  %v910_v14 = vadd.f32 %v887_v38, %v860_v6  ;;  %v1009_v38 = vstv %s1394_s10  ;;  %v1169_v46 = vstv %s1405_s11 }
 0x471   :  { %v1022_v62 = vmul.f32 %v1516_v54, %v1019_v48  ;;  %v1023_v7 = vmul.f32 %v1517_v0, %v1019_v48  ;;  %v1014_v44 = vmul.f32 %v1520_v1, %v1009_v38  ;;  %v1015_v1 = vmul.f32 %v1521_v63, %v1009_v38 }
 0x472   :  { %951 = vmatpush.msrb.mxu1 %v2226_v34  ;;  %v1017_v19 = vmul.f32 %v1525_v3, %v1009_v38 }
 0x473   :  { %1040 = vrot.lane.b32.xlu2 %v1022_v62, %s1659_s25  ;;  %1042 = vrot.lane.b32.xlu0 %v1023_v7, %s1659_s25  ;;  %v1536_v62 = vunpack.c.l.bf16 %v2363_v56 }
 0x474   :  { %952 = vmatpush.msrb.mxu1 %v2230_v18 }
 0x475   :  { %v1174_v5 = vmul.f32 %v1536_v62, %v1169_v46 }
 0x476   :  { %953 = vmatpush.msrb.mxu1 %v2234_v8  ;;  %v901_v51 = vpop.permute.xlu2 %900 }
 0x477   :  { %v917_v2 = vadd.f32 %v901_v51, %v867_v58  ;;  %v1533_v51 = vunpack.c.h.bf16 %v2358_v31 }
 0x478   :  { %954 = vmatpush.msrb.mxu1 %v2238_v35 }
 0x47a   :  { %955 = vmatpush.msrb.mxu1 %v2242_v36 }
 0x47b   :  { %1048 = vrot.lane.b32.xlu0 %v1026_v53, %s1659_s25  ;;  %1046 = vrot.lane.b32.xlu2 %v1025_v17, %s1659_s25  ;;  %v1565_v53 = vld [vmem:[#allocation8 + $0xf8] sm:$0xff]  }
 0x47c   :  { %956 = vmatpush.msrb.mxu1 %v2246_v39  ;;  %v1541_v59 = vunpack.c.h.bf16 %v1565_v53 }
 0x47e   :  { %957 = vmatpush.msrb.mxu1 %v2250_v40  ;;  %v1177_v63 = vmul.f32 %v1541_v59, %v1169_v46 }
 0x47f   :  { %1386 = vmatmul.msk.f32.vlgmr.msrb.gmra.mxu1 %vm167_vm8, %v910_v14 }
 0x487   :  { %1387 = vmatmul.msk.f32.gmra.mxu1 %vm167_vm8, %v911_v45 }
 0x48f   :  { %1388 = vmatmul.msk.f32.gmra.mxu1 %vm167_vm8, %v912_v9 }
 0x497   :  { %1389 = vmatmul.msk.f32.gmra.mxu1 %vm167_vm8, %v913_v42  ;;  %v2356_v42 = vld [vmem:[#allocation8 + $0xe0] sm:$0xff]  }
 0x498   :  { %v1529_v25 = vunpack.c.h.bf16 %v2356_v42 }
 0x49f   :  { %1390 = vmatmul.msk.f32.gmra.mxu1 %vm167_vm8, %v914_v60 }
 0x4a7   :  { %1391 = vmatmul.msk.f32.gmra.mxu1 %vm167_vm8, %v915_v12  ;;  %v1016_v12 = vmul.f32 %v1524_v20, %v1009_v38  ;;  %v1540_v20 = vunpack.c.l.bf16 %v1565_v53 }
 0x4a9   :  { %v1176_v17 = vmul.f32 %v1540_v20, %v1169_v46 }
 0x4af   :  { %1392 = vmatmul.msk.f32.gmra.mxu1 %vm167_vm8, %v916_v57 }
 0x4b7   :  { %1393 = vmatmul.msk.f32.gmra.mxu1 %vm167_vm8, %v917_v2  ;;  %v1173_v2 = vmul.f32 %v1533_v51, %v1169_v46 }
 0x4cd   :  { %v1041_v24 = vpop.permute.xlu2 %1040 }
 0x4d5   :  { %v1047_v4 = vpop.permute.xlu2 %1046 }
 0x4d6   :  { %v1065_v11 = vadd.f32 %v1047_v4, %v1015_v1 }
 0x4fc   :  { %v959_v28 = vpop.f32.mrf.mxu1 }
 0x4fd   :  { %v2340_v10 = vadd.f32 %v959_v28, %v2250_v40  ;;  %v1013_v40 = vmul.f32 %v1517_v0, %v1009_v38  ;;  %v1537_v0 = vunpack.c.h.bf16 %v2363_v56 }
 0x4ff   :  { %v1175_v7 = vmul.f32 %v1537_v0, %v1169_v46 }
 0x504   :  { %v962_v23 = vpop.f32.mrf.mxu1 }
 0x505   :  { %v2336_v21 = vadd.f32 %v962_v23, %v2246_v39  ;;  %v1012_v39 = vmul.f32 %v1516_v54, %v1009_v38  ;;  %v1171_v54 = vmul.f32 %v1529_v25, %v1169_v46 }
 0x507   :  { %v1062_v41 = vadd.f32 %v1041_v24, %v1012_v39  ;;  %1188 = vrot.lane.b32.xlu0 %v1171_v54, %s1659_s25 }
 0x50c   :  { %v965_v22 = vpop.f32.mrf.mxu1 }
 0x50f   :  { %1194 = vrot.lane.b32.xlu0 %v1174_v5, %s1659_s25 }
 0x514   :  { %v968_v27 = vpop.f32.mrf.mxu1 }
 0x515   :  { %v2328_v14 = vadd.f32 %v968_v27, %v2238_v35  ;;  %v1011_v35 = vmul.f32 %v1513_v55, %v1009_v38  ;;  %v1528_v55 = vunpack.c.l.bf16 %v2356_v42 }
 0x517   :  { %v1170_v49 = vmul.f32 %v1528_v55, %v1169_v46  ;;  %1200 = vrot.lane.b32.xlu0 %v1177_v63, %s1659_s25 }
 0x519   :  { %1186 = vrot.lane.b32.xlu2 %v1170_v49, %s1659_s25 }
 0x51c   :  { %v971_v26 = vpop.f32.mrf.mxu1 }
 0x51d   :  { %v2324_v6 = vadd.f32 %v971_v26, %v2234_v8 }
 0x521   :  { %1192 = vrot.lane.b32.xlu2 %v1173_v2, %s1659_s25 }
 0x524   :  { %v974_v29 = vpop.f32.mrf.mxu1 }
 0x525   :  { %v2320_v43 = vadd.f32 %v974_v29, %v2230_v18  ;;  %v1037_v18 = vpop.permute.xlu0 %1036 }
 0x529   :  { %1198 = vrot.lane.b32.xlu2 %v1176_v17, %s1659_s25 }
 0x52c   :  { %v977_v13 = vpop.f32.mrf.mxu1 }
 0x52d   :  { %v2316_v32 = vadd.f32 %v977_v13, %v2226_v34  ;;  %v2332_v34 = vadd.f32 %v965_v22, %v2242_v36  ;;  %v1039_v36 = vpop.permute.xlu1 %1038  ;;  %v1043_v9 = vpop.permute.xlu0 %1042 }
 0x52e   :  { %v1061_v45 = vadd.f32 %v1039_v36, %v1011_v35  ;;  %v1063_v37 = vadd.f32 %v1043_v9, %v1013_v40 }
 0x534   :  { %v980_v15 = vpop.f32.mrf.mxu1 }
 0x535   :  { %v2313_v30 = vadd.f32 %v980_v15, %v2223_v33  ;;  %v1010_v33 = vmul.f32 %v1512_v52, %v1009_v38  ;;  %v1045_v48 = vpop.permute.xlu1 %1044  ;;  %v1532_v52 = vunpack.c.l.bf16 %v2358_v31  ;;  %v1049_v16 = vpop.permute.xlu0 %1048 }
 0x536   :  { %v1064_v60 = vadd.f32 %v1045_v48, %v1014_v44  ;;  %v1066_v47 = vadd.f32 %v1049_v16, %v1016_v12 }
 0x537   :  { %1100 = vmatpush.msrb.mxu2 %v2313_v30  ;;  %v1060_v8 = vadd.f32 %v1037_v18, %v1010_v33  ;;  %v1172_v50 = vmul.f32 %v1532_v52, %v1169_v46  ;;  %v1159_v18 = vstv %s1404_s12 }
 0x538   :  { %v1160_v35 = vmul.f32 %v1528_v55, %v1159_v18  ;;  %v1164_v9 = vmul.f32 %v1536_v62, %v1159_v18  ;;  %v1165_v42 = vmul.f32 %v1537_v0, %v1159_v18  ;;  %v1166_v48 = vmul.f32 %v1540_v20, %v1159_v18 }
 0x539   :  { %1101 = vmatpush.msrb.mxu2 %v2316_v32  ;;  %1190 = vrot.lane.b32.xlu1 %v1172_v50, %s1659_s25  ;;  %v1167_v55 = vmul.f32 %v1541_v59, %v1159_v18 }
 0x53b   :  { %1102 = vmatpush.msrb.mxu2 %v2320_v43 }
 0x53d   :  { %1103 = vmatpush.msrb.mxu2 %v2324_v6  ;;  %v1051_v57 = vpop.permute.xlu1 %1050 }
 0x53e   :  { %v1067_v58 = vadd.f32 %v1051_v57, %v1017_v19 }
 0x53f   :  { %1104 = vmatpush.msrb.mxu2 %v2328_v14 }
 0x541   :  { %1105 = vmatpush.msrb.mxu2 %v2332_v34  ;;  %1196 = vrot.lane.b32.xlu1 %v1175_v7, %s1659_s25 }
 0x543   :  { %1106 = vmatpush.msrb.mxu2 %v2336_v21 }
 0x545   :  { %1107 = vmatpush.msrb.mxu2 %v2340_v10 }
 0x546   :  { %1396 = vmatmul.msk.f32.vlgmr.msrb.gmra.mxu2 %vm167_vm8, %v1060_v8 }
 0x54e   :  { %1397 = vmatmul.msk.f32.gmra.mxu2 %vm167_vm8, %v1061_v45 }
 0x556   :  { %1398 = vmatmul.msk.f32.gmra.mxu2 %vm167_vm8, %v1062_v41  ;;  %v1163_v41 = vmul.f32 %v1533_v51, %v1159_v18 }
 0x55e   :  { %1399 = vmatmul.msk.f32.gmra.mxu2 %vm167_vm8, %v1063_v37 }
 0x566   :  { %1400 = vmatmul.msk.f32.gmra.mxu2 %vm167_vm8, %v1064_v60 }
 0x56e   :  { %1401 = vmatmul.msk.f32.gmra.mxu2 %vm167_vm8, %v1065_v11 }
 0x573   :  { %v1187_v36 = vpop.permute.xlu2 %1186 }
 0x574   :  { %v1210_v45 = vadd.f32 %v1187_v36, %v1160_v35 }
 0x576   :  { %1402 = vmatmul.msk.f32.gmra.mxu2 %vm167_vm8, %v1066_v47 }
 0x57e   :  { %1403 = vmatmul.msk.f32.gmra.mxu2 %vm167_vm8, %v1067_v58 }
 0x5ab   :  { %v1191_v24 = vpop.permute.xlu1 %1190 }
 0x5b3   :  { %v1197_v46 = vpop.permute.xlu1 %1196 }
 0x5b4   :  { %v1215_v31 = vadd.f32 %v1197_v46, %v1165_v42 }
 0x5c9   :  { %v1109_v61 = vpop.f32.mrf.mxu2 }
 0x5d1   :  { %v1112_v3 = vpop.f32.mrf.mxu2 }
 0x5d9   :  { %v1115_v28 = vpop.f32.mrf.mxu2 }
 0x5e1   :  { %v1118_v23 = vpop.f32.mrf.mxu2 }
 0x5e2   :  { %v1136_v8 = vadd.f32 %v1118_v23, %v2328_v14  ;;  %v1189_v14 = vpop.permute.xlu0 %1188 }
 0x5e9   :  { %v1121_v22 = vpop.f32.mrf.mxu2 }
 0x5ea   :  { %v1137_v33 = vadd.f32 %v1121_v22, %v2324_v6  ;;  %v1161_v6 = vmul.f32 %v1529_v25, %v1159_v18  ;;  %v1195_v37 = vpop.permute.xlu0 %1194 }
 0x5eb   :  { %v1214_v44 = vadd.f32 %v1195_v37, %v1164_v9 }
 0x5ec   :  { %v1211_v39 = vadd.f32 %v1189_v14, %v1161_v6 }
 0x5f1   :  { %v1124_v27 = vpop.f32.mrf.mxu2 }
 0x5f2   :  { %v1138_v38 = vadd.f32 %v1124_v27, %v2320_v43  ;;  %v1133_v43 = vadd.f32 %v1109_v61, %v2340_v10  ;;  %v1193_v10 = vpop.permute.xlu2 %1192  ;;  %v1201_v54 = vpop.permute.xlu0 %1200 }
 0x5f3   :  { %v1213_v40 = vadd.f32 %v1193_v10, %v1163_v41  ;;  %v1217_v50 = vadd.f32 %v1201_v54, %v1167_v55 }
 0x5f9   :  { %v1127_v26 = vpop.f32.mrf.mxu2 }
 0x5fa   :  { %v2398_v15 = vadd.f32 %v1127_v26, %v2316_v32  ;;  %v1134_v32 = vadd.f32 %v1112_v3, %v2336_v21  ;;  %v1199_v25 = vpop.permute.xlu2 %1198 }
 0x601   :  { %v1130_v29 = vpop.f32.mrf.mxu2 }
 0x602   :  { %v2395_v13 = vadd.f32 %v1130_v29, %v2313_v30  ;;  %v1135_v30 = vadd.f32 %v1115_v28, %v2332_v34  ;;  %v1162_v34 = vmul.f32 %v1532_v52, %v1159_v18  ;;  %v1216_v52 = vadd.f32 %v1199_v25, %v1166_v48 }
 0x604   :  { %1250 = vmatpush.msrb.mxu3 %v2395_v13  ;;  %v1212_v21 = vadd.f32 %v1191_v24, %v1162_v34 }
 0x606   :  { %1251 = vmatpush.msrb.mxu3 %v2398_v15 }
 0x608   :  { %1252 = vmatpush.msrb.mxu3 %v1138_v38 }
 0x60a   :  { %1253 = vmatpush.msrb.mxu3 %v1137_v33 }
 0x60c   :  { %1254 = vmatpush.msrb.mxu3 %v1136_v8 }
 0x60e   :  { %1255 = vmatpush.msrb.mxu3 %v1135_v30 }
 0x610   :  { %1256 = vmatpush.msrb.mxu3 %v1134_v32 }
 0x612   :  { %1257 = vmatpush.msrb.mxu3 %v1133_v43 }
 0x613   :  { %1406 = vmatmul.msk.f32.vlgmr.msrb.gmra.mxu3 %vm167_vm8, %v1210_v45 }
 0x61b   :  { %1407 = vmatmul.msk.f32.gmra.mxu3 %vm167_vm8, %v1211_v39 }
 0x623   :  { %1408 = vmatmul.msk.f32.gmra.mxu3 %vm167_vm8, %v1212_v21 }
 0x62b   :  { %1409 = vmatmul.msk.f32.gmra.mxu3 %vm167_vm8, %v1213_v40 }
 0x633   :  { %1410 = vmatmul.msk.f32.gmra.mxu3 %vm167_vm8, %v1214_v44 }
 0x63b   :  { %1411 = vmatmul.msk.f32.gmra.mxu3 %vm167_vm8, %v1215_v31 }
 0x643   :  { %1412 = vmatmul.msk.f32.gmra.mxu3 %vm167_vm8, %v1216_v52 }
 0x64b   :  { %1413 = vmatmul.msk.f32.gmra.mxu3 %vm167_vm8, %v1217_v50 }
 0x696   :  { %v1259_v49 = vpop.f32.mrf.mxu3 }
 0x697   :  { %v1283_v60 = vadd.f32 %v1259_v49, %v1133_v43 }
 0x699   :  { %1291 = vst.msk [vmem:[#allocation9] sm:$0xff] %vm167_vm8, %v1283_v60 }
 0x69e   :  { %v1262_v56 = vpop.f32.mrf.mxu3 }
 0x69f   :  { %v1284_v62 = vadd.f32 %v1262_v56, %v1134_v32 }
 0x6a1   :  { %1292 = vst.msk [vmem:[#allocation9 + $0x8] sm:$0xff] %vm167_vm8, %v1284_v62 }
 0x6a6   :  { %v1265_v0 = vpop.f32.mrf.mxu3 }
 0x6a7   :  { %v1285_v1 = vadd.f32 %v1265_v0, %v1135_v30 }
 0x6a9   :  { %1293 = vst.msk [vmem:[#allocation9 + $0x10] sm:$0xff] %vm167_vm8, %v1285_v1 }
 0x6ae   :  { %v1268_v4 = vpop.f32.mrf.mxu3 }
 0x6af   :  { %v1286_v5 = vadd.f32 %v1268_v4, %v1136_v8 }
 0x6b1   :  { %1294 = vst.msk [vmem:[#allocation9 + $0x18] sm:$0xff] %vm167_vm8, %v1286_v5 }
 0x6b6   :  { %v1271_v7 = vpop.f32.mrf.mxu3 }
 0x6b7   :  { %v1287_v11 = vadd.f32 %v1271_v7, %v1137_v33 }
 0x6b9   :  { %1295 = vst.msk [vmem:[#allocation9 + $0x20] sm:$0xff] %vm167_vm8, %v1287_v11 }
 0x6be   :  { %v1274_v12 = vpop.f32.mrf.mxu3 }
 0x6bf   :  { %v1288_v16 = vadd.f32 %v1274_v12, %v1138_v38 }
 0x6c1   :  { %1296 = vst.msk [vmem:[#allocation9 + $0x28] sm:$0xff] %vm167_vm8, %v1288_v16 }
 0x6c6   :  { %v1277_v47 = vpop.f32.mrf.mxu3 }
 0x6c7   :  { %v1289_v19 = vadd.f32 %v1277_v47, %v2398_v15 }
 0x6c9   :  { %1297 = vst.msk [vmem:[#allocation9 + $0x30] sm:$0xff] %vm167_vm8, %v1289_v19 }
 0x6ce   :  { %v1280_v57 = vpop.f32.mrf.mxu3 }
 0x6cf   :  { %v1290_v58 = vadd.f32 %v1280_v57, %v2395_v13 }
 0x6d1   :  { %1298 = vst.msk [vmem:[#allocation9 + $0x38] sm:$0xff] %vm167_vm8, %v1290_v58 }
 0x6d2   :  { %1311 = dma.vmem_to_hbm [thread:$0]  %s1304_s14, 1024, %s1306_s17, [#allocation4], %s1664_s18, %s1664_s18, %s1665_s19  }
 0x6d3   :  { %1654 = dma.done.wait [#allocation4], 1024  }
 0x6d4   :  { %1655 = vsyncadd [#allocation4], 4294966272 }
 0x6d5   :  { %1316 = vsyncpa [#allocation3], 1 }
 0x6d6   :  { %1317 = vsyncpa [#allocation4], 1 }
 0x6d7   :  { %1318 = vsyncpa [#allocation5], 1 }
 0x6d8   :  { %1319 = vsyncpa [#allocation7], 1 }

</bundles_post_ra>
